<compile_context>
chip_gen: v7x
topology: tpu7x:2x2x1
jax: 0.10.0
libtpu: 0.0.40
codegen_flags: <defaults>
</compile_context>

<pallas_src>
import functools

import jax
import jax.numpy as jnp
from jax.experimental import pallas as pl
from jax.experimental.pallas import tpu as pltpu

NEG_SLOPE = 0.01       # torch.leaky_relu default negative_slope
H1, H1P = 400, 512     # hidden 1 size, padded to a lane multiple
H2, H2P = 300, 384     # hidden 2 size, padded to a lane multiple
BATCH_TILE = 256       # default batch tile; 512 for very large batches


def _device_kind():
    try:
        return jax.devices()[0].device_kind.lower()
    except Exception:
        return ""


_KIND = _device_kind()
# v6e / v7x VALUs handle packed bf16; v5e (and older) do not.
_BF16_VPU = not any(s in _KIND for s in ("v2", "v3", "v4", "v5"))
# v7x has 2 TensorCores per chip; earlier single-TC.
_NUM_TC = 2 if "v7" in _KIND else 1
_COMPUTE_DT = jnp.bfloat16 if _BF16_VPU else jnp.float32


def _leaky_relu(z):
    return jnp.where(z >= 0, z, NEG_SLOPE * z)


# ----------------------------------------------------------------------------
# Kernel
# ----------------------------------------------------------------------------
def critic_td3_kernel(
    use_bf16_vpu,                     # static python bool (functools.partial)
    x_ref, u_ref,                     # (tb, state_dim), (tb, action_dim)  bf16
    w14_ref,                          # fused l1|l4 (+bias row): (D+1, 2*H1P) bf16
    w2_ref, b2_ref,                   # l2: (H1P, H2P) bf16, (1, H2P) bf16/f32
    w5_ref, b5_ref,                   # l5: (H1P, H2P) bf16, (1, H2P) bf16/f32
    w36_ref,                          # fused heads, block-diag (2*H2P, 2) bf16
    b36_ref,                          # (1, 2) f32 head bias
    q_ref,                            # output (tb, 2) f32: [:,0]=q1 [:,1]=q2
):
    cdt = jnp.bfloat16 if use_bf16_vpu else jnp.float32
    tb = x_ref.shape[0]

    # In-kernel concat [x | u | 1.0]; the trailing ones column carries the
    # fused layer-1 bias through the MXU (no broadcast add needed).
    xu = jnp.concatenate(
        [x_ref[...], u_ref[...], jnp.ones((tb, 1), jnp.bfloat16)], axis=-1)

    # Single fused layer-1 pass for both branches.
    h = jnp.dot(xu, w14_ref[...], preferred_element_type=jnp.float32)  # (tb, 2*H1P) f32
    h = _leaky_relu(h.astype(cdt)).astype(jnp.bfloat16)
    h1 = h[:, :H1P]          # branch 1 (l1) hidden   -- tile-aligned slice
    h2 = h[:, H1P:]          # branch 2 (l4) hidden

    g1 = jnp.dot(h1, w2_ref[...], preferred_element_type=jnp.float32)
    g1 = _leaky_relu(g1.astype(cdt) + b2_ref[...]).astype(jnp.bfloat16)
    g2 = jnp.dot(h2, w5_ref[...], preferred_element_type=jnp.float32)
    g2 = _leaky_relu(g2.astype(cdt) + b5_ref[...]).astype(jnp.bfloat16)

    # Fused twin heads: [g1 | g2] (384-lane aligned concat) @ block-diag w3|w6.
    g = jnp.concatenate([g1, g2], axis=-1)                             # (tb, 2*H2P)
    q = jnp.dot(g, w36_ref[...], preferred_element_type=jnp.float32) + b36_ref[...]
    q_ref[...] = q.astype(q_ref.dtype)


# ----------------------------------------------------------------------------
# One-time parameter packing (cache the result; do NOT call per forward).
# ----------------------------------------------------------------------------
def _pad_T(W, in_pad, out_pad):
    """torch-layout (out, in) -> zero-padded, transposed (in_pad, out_pad) f32."""
    out_d, in_d = W.shape
    Wt = jnp.zeros((in_pad, out_pad), jnp.float32)
    return Wt.at[:in_d, :out_d].set(jnp.asarray(W, jnp.float32).T)


def _pad_b(b, out_pad):
    bb = jnp.zeros((1, out_pad), jnp.float32)
    return bb.at[0, : b.shape[0]].set(jnp.asarray(b, jnp.float32))


def pack_params(params, state_dim, action_dim):
    """Transpose + pad + bf16-cast weights; fuse l1|l4 (+bias row) and l3|l6."""
    W1, b1 = params["l1"]; W2, b2 = params["l2"]; W3, b3 = params["l3"]
    W4, b4 = params["l4"]; W5, b5 = params["l5"]; W6, b6 = params["l6"]
    D = state_dim + action_dim
    K = D + 1  # trailing ones column carries the layer-1 biases

    w14 = jnp.zeros((K, 2 * H1P), jnp.float32)
    w14 = w14.at[:D, :H1].set(jnp.asarray(W1, jnp.float32).T)
    w14 = w14.at[D, :H1].set(jnp.asarray(b1, jnp.float32))
    w14 = w14.at[:D, H1P:H1P + H1].set(jnp.asarray(W4, jnp.float32).T)
    w14 = w14.at[D, H1P:H1P + H1].set(jnp.asarray(b4, jnp.float32))
    w14 = w14.astype(jnp.bfloat16)

    w2p = _pad_T(W2, H1P, H2P).astype(jnp.bfloat16)
    w5p = _pad_T(W5, H1P, H2P).astype(jnp.bfloat16)
    bias_dt = _COMPUTE_DT
    b2p = _pad_b(b2, H2P).astype(bias_dt)
    b5p = _pad_b(b5, H2P).astype(bias_dt)

    # Block-diagonal fused head: col 0 = q1 (w3), col 1 = q2 (w6).
    w36 = jnp.zeros((2 * H2P, 2), jnp.float32)
    w36 = w36.at[:H2, 0].set(jnp.asarray(W3, jnp.float32)[0])
    w36 = w36.at[H2P:H2P + H2, 1].set(jnp.asarray(W6, jnp.float32)[0])
    w36 = w36.astype(jnp.bfloat16)

    b36 = jnp.array([[float(b3[0]), float(b6[0])]], jnp.float32)  # (1, 2)
    return (w14, w2p, b2p, w5p, b5p, w36, b36)


# ----------------------------------------------------------------------------
# Forward wrapper
# ----------------------------------------------------------------------------
def _resident_spec(arr):
    """Full-array block that stays resident across all grid steps."""
    nd = arr.ndim
    return pl.BlockSpec(arr.shape, lambda i: (0,) * nd)


def _choose_tile(B):
    target = 512 if B >= 2048 else BATCH_TILE
    if _NUM_TC >= 2 and B >= 64:
        # Guarantee >= 2 grid steps so both v7x TensorCores get work.
        half = (((B + 1) // 2) + 7) // 8 * 8
        return min(target, half)
    if B <= target:
        return B
    return target


@jax.jit
def critic_td3_forward(x, u, packed):
    """Pallas twin-critic forward.  Returns (q1, q2), each (B, 1) float32."""
    (w14, w2p, b2p, w5p, b5p, w36, b36) = packed
    B, state_dim = x.shape
    action_dim = u.shape[1]

    x = x.astype(jnp.bfloat16)
    u = u.astype(jnp.bfloat16)

    tb = _choose_tile(B)
    grid_n = pl.cdiv(B, tb)
    Bp = grid_n * tb
    if Bp != B:  # pad awkward batch sizes instead of one giant untiled block
        x = jnp.pad(x, ((0, Bp - B), (0, 0)))
        u = jnp.pad(u, ((0, Bp - B), (0, 0)))

    in_specs = [
        pl.BlockSpec((tb, state_dim), lambda i: (i, 0)),
        pl.BlockSpec((tb, action_dim), lambda i: (i, 0)),
        _resident_spec(w14),
        _resident_spec(w2p), _resident_spec(b2p),
        _resident_spec(w5p), _resident_spec(b5p),
        _resident_spec(w36), _resident_spec(b36),
    ]
    out_spec = pl.BlockSpec((tb, 2), lambda i: (i, 0))

    q = pl.pallas_call(
        functools.partial(critic_td3_kernel, _BF16_VPU),
        out_shape=jax.ShapeDtypeStruct((Bp, 2), jnp.float32),
        grid=(grid_n,),
        in_specs=in_specs,
        out_specs=out_spec,
        compiler_params=pltpu.CompilerParams(
            dimension_semantics=("parallel",),
            vmem_limit_bytes=32 << 20,
        ),
    )(x, u, w14, w2p, b2p, w5p, b5p, w36, b36)

    q = q[:B]
    return q[:, 0:1], q[:, 1:2]


# ----------------------------------------------------------------------------
# Init + references
# ----------------------------------------------------------------------------
def init_params(key, state_dim, action_dim):
    """Deterministic init matching nn.Linear shapes: W (out, in), b (out,)."""
    dims = {
        "l1": (H1, state_dim + action_dim),
        "l2": (H2, H1),
        "l3": (1, H2),
        "l4": (H1, state_dim + action_dim),
        "l5": (H2, H1),
        "l6": (1, H2),
    }
    params = {}
    for name, (out_d, in_d) in dims.items():
        key, kw, kb = jax.random.split(key, 3)
        bound = 1.0 / jnp.sqrt(in_d)  # torch.nn.Linear default init range
        W = jax.random.uniform(kw, (out_d, in_d), jnp.float32, -bound, bound)
        b = jax.random.uniform(kb, (out_d,), jnp.float32, -bound, bound)
        params[name] = (W, b)
    return params


def critic_td3_reference(x, u, params, *, mixed=True):
    """Pure-JAX reference.  mixed=True mirrors the kernel's bf16/f32 numerics."""
    if not mixed:
        xu = jnp.concatenate([x, u], axis=1).astype(jnp.float32)

        def branch32(n1, n2, n3):
            W1, b1 = params[n1]; W2, b2 = params[n2]; W3, b3 = params[n3]
            h = jax.nn.leaky_relu(xu @ W1.T + b1, NEG_SLOPE)
            h = jax.nn.leaky_relu(h @ W2.T + b2, NEG_SLOPE)
            return h @ W3.T + b3

        return branch32("l1", "l2", "l3"), branch32("l4", "l5", "l6")

    cdt = _COMPUTE_DT
    bf = lambda a: jnp.asarray(a, jnp.float32).astype(jnp.bfloat16)
    xu = jnp.concatenate(
        [x.astype(jnp.bfloat16), u.astype(jnp.bfloat16),
         jnp.ones((x.shape[0], 1), jnp.bfloat16)], axis=1)

    def branch(n1, n2, n3):
        W1, b1 = params[n1]; W2, b2 = params[n2]; W3, b3 = params[n3]
        w1aug = jnp.concatenate([bf(W1.T), bf(b1)[None, :]], axis=0)
        h = jnp.dot(xu, w1aug, preferred_element_type=jnp.float32)
        h = jax.nn.leaky_relu(h.astype(cdt), NEG_SLOPE).astype(jnp.bfloat16)
        g = jnp.dot(h, bf(W2.T), preferred_element_type=jnp.float32)
        g = jax.nn.leaky_relu(g.astype(cdt) + b2.astype(cdt), NEG_SLOPE).astype(jnp.bfloat16)
        return jnp.dot(g, bf(W3.T), preferred_element_type=jnp.float32) + b3

    return branch("l1", "l2", "l3"), branch("l4", "l5", "l6")


if __name__ == "__main__":
    key = jax.random.PRNGKey(0)
    state_dim, action_dim = 17, 6

    kp, kd = jax.random.split(key)
    params = init_params(kp, state_dim, action_dim)
    packed = pack_params(params, state_dim, action_dim)   # one-time packing, cached

    # batch=8: single-block path.  batch=300: tiled + padded (and 2-TC on v7x).
    for batch in (8, 300):
        kx, ku = jax.random.split(jax.random.fold_in(kd, batch))
        x = jax.random.normal(kx, (batch, state_dim), jnp.float32)
        u = jax.random.normal(ku, (batch, action_dim), jnp.float32)

        q1, q2 = critic_td3_forward(x, u, packed)
        jax.block_until_ready((q1, q2))

        assert q1.shape == (batch, 1) and q2.shape == (batch, 1)

        # Tight check against a reference with matching mixed-precision rounding.
        r1, r2 = critic_td3_reference(x, u, params, mixed=True)
        assert jnp.allclose(q1, r1, atol=3e-3, rtol=3e-3), float(jnp.max(jnp.abs(q1 - r1)))
        assert jnp.allclose(q2, r2, atol=3e-3, rtol=3e-3), float(jnp.max(jnp.abs(q2 - r2)))

        # Loose check against the pure-f32 PyTorch-equivalent reference.
        f1, f2 = critic_td3_reference(x, u, params, mixed=False)
        assert jnp.allclose(q1, f1, atol=5e-2, rtol=5e-2)
        assert jnp.allclose(q2, f2, atol=5e-2, rtol=5e-2)

    print("KERNEL_OK")
</pallas_src>

<mosaic_0001>
module attributes {stable_mosaic.version = 11 : i64} {
  func.func @critic_td3_kernel(%arg0: i32, %arg1: memref<8x17xbf16, #tpu.memory_space<vmem>>, %arg2: memref<8x6xbf16, #tpu.memory_space<vmem>>, %arg3: memref<24x1024xbf16, #tpu.memory_space<vmem>>, %arg4: memref<512x384xbf16, #tpu.memory_space<vmem>>, %arg5: memref<1x384xbf16, #tpu.memory_space<vmem>>, %arg6: memref<512x384xbf16, #tpu.memory_space<vmem>>, %arg7: memref<1x384xbf16, #tpu.memory_space<vmem>>, %arg8: memref<768x2xbf16, #tpu.memory_space<vmem>>, %arg9: memref<1x2xf32, #tpu.memory_space<vmem>>, %arg10: memref<8x2xf32, #tpu.memory_space<vmem>>) attributes {dimension_semantics = [#tpu.dimension_semantics<parallel>], iteration_bounds = array<i64: 1>, scalar_prefetch = 0 : i64, scratch_operands = 0 : i64, tpu.core_type = #tpu.core_type<tc>, window_params = [{transform_indices = @transform_0, window_bounds = array<i64: 8, 17>}, {transform_indices = @transform_1, window_bounds = array<i64: 8, 6>}, {pipeline_mode = #tpu.pipeline_mode<synchronous>, transform_indices = @transform_2, window_bounds = array<i64: 24, 1024>}, {pipeline_mode = #tpu.pipeline_mode<synchronous>, transform_indices = @transform_3, window_bounds = array<i64: 512, 384>}, {pipeline_mode = #tpu.pipeline_mode<synchronous>, transform_indices = @transform_4, window_bounds = array<i64: 1, 384>}, {pipeline_mode = #tpu.pipeline_mode<synchronous>, transform_indices = @transform_5, window_bounds = array<i64: 512, 384>}, {pipeline_mode = #tpu.pipeline_mode<synchronous>, transform_indices = @transform_6, window_bounds = array<i64: 1, 384>}, {pipeline_mode = #tpu.pipeline_mode<synchronous>, transform_indices = @transform_7, window_bounds = array<i64: 768, 2>}, {pipeline_mode = #tpu.pipeline_mode<synchronous>, transform_indices = @transform_8, window_bounds = array<i64: 1, 2>}, {transform_indices = @transform_9, window_bounds = array<i64: 8, 2>}]} {
    %c0 = arith.constant 0 : index
    %c0_0 = arith.constant 0 : index
    %0 = vector.load %arg1[%c0, %c0_0] : memref<8x17xbf16, #tpu.memory_space<vmem>>, vector<8x17xbf16>
    %c0_1 = arith.constant 0 : index
    %c0_2 = arith.constant 0 : index
    %1 = vector.load %arg2[%c0_1, %c0_2] : memref<8x6xbf16, #tpu.memory_space<vmem>>, vector<8x6xbf16>
    %cst = arith.constant 1.000000e+00 : bf16
    %2 = vector.broadcast %cst : bf16 to vector<8x1xbf16>
    %3 = tpu.concatenate %0, %1, %2 in 1 : vector<8x17xbf16>, vector<8x6xbf16>, vector<8x1xbf16> -> vector<8x24xbf16>
    %c0_3 = arith.constant 0 : index
    %c0_4 = arith.constant 0 : index
    %4 = vector.load %arg3[%c0_3, %c0_4] : memref<24x1024xbf16, #tpu.memory_space<vmem>>, vector<24x1024xbf16>
    %cst_5 = arith.constant dense<0.000000e+00> : vector<8x1024xf32>
    %5 = tpu.matmul %3, %4, %cst_5 {dimension_numbers = #tpu.dot_dimension_numbers<[1], [0], [0], [1], [0, 0, 1, 1], [], []>} : vector<8x24xbf16>, vector<24x1024xbf16>, vector<8x1024xf32> -> vector<8x1024xf32>
    %6 = arith.truncf %5 : vector<8x1024xf32> to vector<8x1024xbf16>
    %cst_6 = arith.constant 0.000000e+00 : bf16
    %7 = vector.broadcast %cst_6 : bf16 to vector<8x1024xbf16>
    %8 = arith.cmpf oge, %6, %7 : vector<8x1024xbf16>
    %cst_7 = arith.constant 1.000980e-02 : bf16
    %9 = vector.broadcast %cst_7 : bf16 to vector<8x1024xbf16>
    %10 = arith.mulf %9, %6 : vector<8x1024xbf16>
    %11 = arith.select %8, %6, %10 : vector<8x1024xi1>, vector<8x1024xbf16>
    %12 = vector.extract_strided_slice %11 {offsets = [0, 0], sizes = [8, 512], strides = [1, 1]} : vector<8x1024xbf16> to vector<8x512xbf16>
    %13 = vector.extract_strided_slice %11 {offsets = [0, 512], sizes = [8, 512], strides = [1, 1]} : vector<8x1024xbf16> to vector<8x512xbf16>
    %c0_8 = arith.constant 0 : index
    %c0_9 = arith.constant 0 : index
    %14 = vector.load %arg4[%c0_8, %c0_9] : memref<512x384xbf16, #tpu.memory_space<vmem>>, vector<512x384xbf16>
    %cst_10 = arith.constant dense<0.000000e+00> : vector<8x384xf32>
    %15 = tpu.matmul %12, %14, %cst_10 {dimension_numbers = #tpu.dot_dimension_numbers<[1], [0], [0], [1], [0, 0, 1, 1], [], []>} : vector<8x512xbf16>, vector<512x384xbf16>, vector<8x384xf32> -> vector<8x384xf32>
    %16 = arith.truncf %15 : vector<8x384xf32> to vector<8x384xbf16>
    %c0_11 = arith.constant 0 : index
    %c0_12 = arith.constant 0 : index
    %17 = vector.load %arg5[%c0_11, %c0_12] : memref<1x384xbf16, #tpu.memory_space<vmem>>, vector<1x384xbf16>
    %18 = vector.broadcast %17 : vector<1x384xbf16> to vector<8x384xbf16>
    %19 = arith.addf %16, %18 : vector<8x384xbf16>
    %cst_13 = arith.constant 0.000000e+00 : bf16
    %20 = vector.broadcast %cst_13 : bf16 to vector<8x384xbf16>
    %21 = arith.cmpf oge, %19, %20 : vector<8x384xbf16>
    %cst_14 = arith.constant 1.000980e-02 : bf16
    %22 = vector.broadcast %cst_14 : bf16 to vector<8x384xbf16>
    %23 = arith.mulf %22, %19 : vector<8x384xbf16>
    %24 = arith.select %21, %19, %23 : vector<8x384xi1>, vector<8x384xbf16>
    %c0_15 = arith.constant 0 : index
    %c0_16 = arith.constant 0 : index
    %25 = vector.load %arg6[%c0_15, %c0_16] : memref<512x384xbf16, #tpu.memory_space<vmem>>, vector<512x384xbf16>
    %cst_17 = arith.constant dense<0.000000e+00> : vector<8x384xf32>
    %26 = tpu.matmul %13, %25, %cst_17 {dimension_numbers = #tpu.dot_dimension_numbers<[1], [0], [0], [1], [0, 0, 1, 1], [], []>} : vector<8x512xbf16>, vector<512x384xbf16>, vector<8x384xf32> -> vector<8x384xf32>
    %27 = arith.truncf %26 : vector<8x384xf32> to vector<8x384xbf16>
    %c0_18 = arith.constant 0 : index
    %c0_19 = arith.constant 0 : index
    %28 = vector.load %arg7[%c0_18, %c0_19] : memref<1x384xbf16, #tpu.memory_space<vmem>>, vector<1x384xbf16>
    %29 = vector.broadcast %28 : vector<1x384xbf16> to vector<8x384xbf16>
    %30 = arith.addf %27, %29 : vector<8x384xbf16>
    %cst_20 = arith.constant 0.000000e+00 : bf16
    %31 = vector.broadcast %cst_20 : bf16 to vector<8x384xbf16>
    %32 = arith.cmpf oge, %30, %31 : vector<8x384xbf16>
    %cst_21 = arith.constant 1.000980e-02 : bf16
    %33 = vector.broadcast %cst_21 : bf16 to vector<8x384xbf16>
    %34 = arith.mulf %33, %30 : vector<8x384xbf16>
    %35 = arith.select %32, %30, %34 : vector<8x384xi1>, vector<8x384xbf16>
    %36 = tpu.concatenate %24, %35 in 1 : vector<8x384xbf16>, vector<8x384xbf16> -> vector<8x768xbf16>
    %c0_22 = arith.constant 0 : index
    %c0_23 = arith.constant 0 : index
    %37 = vector.load %arg8[%c0_22, %c0_23] : memref<768x2xbf16, #tpu.memory_space<vmem>>, vector<768x2xbf16>
    %cst_24 = arith.constant dense<0.000000e+00> : vector<8x2xf32>
    %38 = tpu.matmul %36, %37, %cst_24 {dimension_numbers = #tpu.dot_dimension_numbers<[1], [0], [0], [1], [0, 0, 1, 1], [], []>} : vector<8x768xbf16>, vector<768x2xbf16>, vector<8x2xf32> -> vector<8x2xf32>
    %c0_25 = arith.constant 0 : index
    %c0_26 = arith.constant 0 : index
    %39 = vector.load %arg9[%c0_25, %c0_26] : memref<1x2xf32, #tpu.memory_space<vmem>>, vector<1x2xf32>
    %40 = vector.broadcast %39 : vector<1x2xf32> to vector<8x2xf32>
    %41 = arith.addf %38, %40 : vector<8x2xf32>
    %c0_27 = arith.constant 0 : index
    %c0_28 = arith.constant 0 : index
    %42 = vector.load %arg10[%c0_27, %c0_28] : memref<8x2xf32, #tpu.memory_space<vmem>>, vector<8x2xf32>
    tpu.vector_store %arg10[%c0_27, %c0_28], %41 {strides = array<i32>} : memref<8x2xf32, #tpu.memory_space<vmem>>, vector<8x2xf32>,
    return
  }
  func.func @transform_0(%arg0: i32) -> (i32, i32) {
    %c0_i32 = arith.constant 0 : i32
    %c0_i32_0 = arith.constant 0 : i32
    return %arg0, %c0_i32 : i32, i32
  }
  func.func @transform_1(%arg0: i32) -> (i32, i32) {
    %c0_i32 = arith.constant 0 : i32
    %c0_i32_0 = arith.constant 0 : i32
    return %arg0, %c0_i32 : i32, i32
  }
  func.func @transform_2(%arg0: i32) -> (i32, i32) {
    %c0_i32 = arith.constant 0 : i32
    %c0_i32_0 = arith.constant 0 : i32
    %c0_i32_1 = arith.constant 0 : i32
    return %c0_i32, %c0_i32_0 : i32, i32
  }
  func.func @transform_3(%arg0: i32) -> (i32, i32) {
    %c0_i32 = arith.constant 0 : i32
    %c0_i32_0 = arith.constant 0 : i32
    %c0_i32_1 = arith.constant 0 : i32
    return %c0_i32, %c0_i32_0 : i32, i32
  }
  func.func @transform_4(%arg0: i32) -> (i32, i32) {
    %c0_i32 = arith.constant 0 : i32
    %c0_i32_0 = arith.constant 0 : i32
    %c0_i32_1 = arith.constant 0 : i32
    return %c0_i32, %c0_i32_0 : i32, i32
  }
  func.func @transform_5(%arg0: i32) -> (i32, i32) {
    %c0_i32 = arith.constant 0 : i32
    %c0_i32_0 = arith.constant 0 : i32
    %c0_i32_1 = arith.constant 0 : i32
    return %c0_i32, %c0_i32_0 : i32, i32
  }
  func.func @transform_6(%arg0: i32) -> (i32, i32) {
    %c0_i32 = arith.constant 0 : i32
    %c0_i32_0 = arith.constant 0 : i32
    %c0_i32_1 = arith.constant 0 : i32
    return %c0_i32, %c0_i32_0 : i32, i32
  }
  func.func @transform_7(%arg0: i32) -> (i32, i32) {
    %c0_i32 = arith.constant 0 : i32
    %c0_i32_0 = arith.constant 0 : i32
    %c0_i32_1 = arith.constant 0 : i32
    return %c0_i32, %c0_i32_0 : i32, i32
  }
  func.func @transform_8(%arg0: i32) -> (i32, i32) {
    %c0_i32 = arith.constant 0 : i32
    %c0_i32_0 = arith.constant 0 : i32
    %c0_i32_1 = arith.constant 0 : i32
    return %c0_i32, %c0_i32_0 : i32, i32
  }
  func.func @transform_9(%arg0: i32) -> (i32, i32) {
    %c0_i32 = arith.constant 0 : i32
    %c0_i32_0 = arith.constant 0 : i32
    return %arg0, %c0_i32 : i32, i32
  }
}

</mosaic_0001>

<bundles_post_ra>
// kernel: critic_td3_forward.1
= control target key start
LH: loop header
LB: loop body
LE: loop exit
PB: predicated region body
PF: predicated region fallthrough
CT: control target
= control target key end

     0   :  { %14 = vsyncpa [#allocation3], 0  ;;  %s3765_s0 = inlined_call_operand.vmem [shape: bf16[8,17], index: 0, kind: input, shape index: {}]   ;;  %s3766_s1 = inlined_call_operand.vmem [shape: bf16[8,6], index: 1, kind: input, shape index: {}]   ;;  %s3767_s2 = inlined_call_operand.vmem [shape: bf16[24,1024], index: 2, kind: input, shape index: {}]   ;;  %s3768_s3 = inlined_call_operand.hbm [shape: bf16[512,384], index: 3, kind: input, shape index: {}]   ;;  %s3769_s4 = inlined_call_operand.vmem [shape: bf16[1,384], index: 4, kind: input, shape index: {}]   ;;  %s3770_s5 = inlined_call_operand.hbm [shape: bf16[512,384], index: 5, kind: input, shape index: {}]   ;;  %s3771_s6 = inlined_call_operand.vmem [shape: bf16[1,384], index: 6, kind: input, shape index: {}]   ;;  %s3772_s7 = inlined_call_operand.vmem [shape: bf16[768,2], index: 7, kind: input, shape index: {}]   ;;  %s3773_s8 = inlined_call_operand.vmem [shape: f32[1,2], index: 8, kind: input, shape index: {}]   ;;  %s3774_s9 = inlined_call_operand.vmem [shape: f32[8,2], index: 9, kind: output, shape index: {}]  }
   0x1   :  { %15 = vsyncpa [#allocation5], 0  ;;  %s3416_s30 = smov [#allocation2]   ;;  %s3368_s13 = scalar_lea.hbm %s3768_s3, 12288 }
   0x2   :  { %s27_s10 = sshll.u32 %s3416_s30, 4  ;;  %p3369_p0 = scmp.ne.s32.totalorder %s3768_s3, %s3368_s13  ;;  %s28_s10 = int_to_ptr.vmem [resolvable:$true] %s27_s10 }
   0x3   :  { %p3372_p1 = scmp.lt.u32.totalorder %s3368_s13, %s3768_s3 }
   0x5   :  { %p3374_p2 = pnand %p3372_p1, %p3369_p0 }
   0x7   :  { %3377 = shalt.err (!%p3374_p2)
}
   0x8   :  { %s3378_s18 = scalar_lea.vmem %s28_s10, 12288  ;;  %p3383_p4 = scmp.lt.s32.totalorder %s28_s10, %s28_s10 }
   0x9   :  { %p3379_p3 = scmp.ne.s32.totalorder %s28_s10, %s3378_s18  ;;  %p3384_p5 = scmp.lt.s32.totalorder %s3378_s18, %s3378_s18 }
   0xb   :  { %p3385_p6 = por %p3384_p5, %p3383_p4 }
   0xd   :  { %p3386_p7 = pnand %p3385_p6, %p3379_p3 }
   0xf   :  { %3389 = shalt.err (!%p3386_p7)
}
  0x10   :  { %s3417_s19 = smov 192   ;;  %s3418_s20 = smov 12  }
  0x11   :  { %33 = dma.hbm_to_vmem [thread:$0]  %s3768_s3, 12288, %s28_s10, [#allocation3], %s3417_s19, %s3417_s19, %s3418_s20  }
  0x12   :  { %s3419_s23 = smov [#allocation4]   ;;  %s3390_s27 = scalar_lea.hbm %s3770_s5, 12288 }
  0x13   :  { %s41_s24 = sshll.u32 %s3419_s23, 4  ;;  %p3391_p8 = scmp.ne.s32.totalorder %s3770_s5, %s3390_s27  ;;  %s42_s24 = int_to_ptr.vmem [resolvable:$true] %s41_s24 }
  0x14   :  { %p3394_p9 = scmp.lt.u32.totalorder %s3390_s27, %s3770_s5 }
  0x16   :  { %p3396_p10 = pnand %p3394_p9, %p3391_p8 }
  0x18   :  { %3399 = shalt.err (!%p3396_p10)
}
  0x19   :  { %s3400_s12 = scalar_lea.vmem %s42_s24, 12288  ;;  %p3405_p12 = scmp.lt.s32.totalorder %s42_s24, %s42_s24 }
  0x1a   :  { %p3401_p11 = scmp.ne.s32.totalorder %s42_s24, %s3400_s12  ;;  %p3406_p13 = scmp.lt.s32.totalorder %s3400_s12, %s3400_s12 }
  0x1c   :  { %p3407_p0 = por %p3406_p13, %p3405_p12 }
  0x1e   :  { %p3408_p1 = pnand %p3407_p0, %p3401_p11 }
  0x20   :  { %3411 = shalt.err (!%p3408_p1)
}
  0x21   :  { %47 = dma.hbm_to_vmem [thread:$0]  %s3770_s5, 12288, %s42_s24, [#allocation5], %s3417_s19, %s3417_s19, %s3418_s20  }
  0x22   :  { %3412 = dma.done.wait [#allocation3], 12288  }
  0x23   :  { %3413 = vsyncadd [#allocation3], 4294955008 }
  0x24   :  { %3414 = dma.done.wait [#allocation5], 12288  }
  0x25   :  { %3415 = vsyncadd [#allocation5], 4294955008  ;;  %v3420_v0 = vmov 0   ;;  %v3055_v1 = vld [vmem:[%s3766_s1] ss:$0 sps:$4 sm:$0xff]   ;;  %s3421_s20 = smov 17  }
  0x26   :  { %209 = vmatprep.mubr.bf16.mxu1 %v3420_v0  ;;  %v77_v2 = vld [vmem:[%s3767_s2] sm:$0xff]  ;;  %68 = vrot.lane.b32.xlu0 %v3055_v1, %s3421_s20  ;;  %v3513_v9 = vld [vmem:[%s3767_s2 + $0x8] sm:$0xff]  ;;  %vm152_vm0 = vcmask 1043456   ;;  %v3072_v19 = vld [vmem:[#allocation2 + $0x30] ss:$12 sps:$4 sm:$0xff]   ;;  %vm70_vm1 = vcmask 138240  }
  0x27   :  { %v81_v3 = vld [vmem:[%s3767_s2 + $0x20] sm:$0xff]  ;;  %v3518_v10 = vld [vmem:[%s3767_s2 + $0x28] sm:$0xff]  ;;  %v3084_v27 = vld [vmem:[#allocation2 + $0x90] ss:$12 sps:$4 sm:$0xff]   ;;  %vm74_vm2 = vcmask 187392   ;;  %vm149_vm3 = vcmask 195584  }
  0x28   :  { %v85_v4 = vld [vmem:[%s3767_s2 + $0x40] sm:$0xff]  ;;  %v2620_v5 = vcombine.high %v77_v2, %v81_v3  ;;  %v2619_v6 = vcombine.low %v77_v2, %v81_v3  ;;  %v2621_v11 = vcombine.low %v3513_v9, %v3518_v10  ;;  %v2622_v13 = vcombine.high %v3513_v9, %v3518_v10  ;;  %v3067_v16 = vld [vmem:[#allocation2 + $0x1c] ss:$12 sps:$4 sm:$0xff]   ;;  %v3073_v20 = vld [vmem:[#allocation2 + $0x4c] ss:$12 sps:$4 sm:$0xff]  }
  0x29   :  { %v2628_v7 = vcombine.high %v85_v4, %v85_v4  ;;  %v2627_v8 = vcombine.low %v85_v4, %v85_v4  ;;  %v3064_v14 = vld [vmem:[#allocation2 + $0x4] ss:$12 sps:$4 sm:$0xff]   ;;  %v3066_v15 = vld [vmem:[#allocation2] ss:$12 sps:$4 sm:$0xff]   ;;  %v3075_v21 = vld [vmem:[#allocation2 + $0x48] ss:$12 sps:$4 sm:$0xff]  }
  0x2a   :  { %177 = vmatprep.subr.bf16.mxu1 %v2620_v5  ;;  %1013 = vmatprep.subr.bf16.mxu0 %v3064_v14  ;;  %v3069_v17 = vld [vmem:[#allocation2 + $0x18] ss:$12 sps:$4 sm:$0xff]   ;;  %v3070_v18 = vld [vmem:[#allocation2 + $0x34] ss:$12 sps:$4 sm:$0xff]   ;;  %v3079_v24 = vld [vmem:[#allocation2 + $0x7c] ss:$12 sps:$4 sm:$0xff]  }
  0x2b   :  { %178 = vmatpush1.bf16.msra.mxu1 %v2619_v6  ;;  %v154_v12 = vsel %vm152_vm0, %v2627_v8, 0  ;;  %1014 = vmatpush1.bf16.msra.mxu0 %v3066_v15  ;;  %v3076_v22 = vld [vmem:[#allocation2 + $0x64] ss:$12 sps:$4 sm:$0xff]   ;;  %v3078_v23 = vld [vmem:[#allocation2 + $0x60] ss:$12 sps:$4 sm:$0xff]   ;;  %v80_v58 = vld [vmem:[%s3767_s2 + $0x18] sm:$0xff] }
  0x2c   :  { %2635 = vmatprep.subr.msk.bf16.mxu1 %vm152_vm0, %v2628_v7  ;;  %1015 = vmatprep.subr.bf16.mxu0 %v3067_v16  ;;  %v3081_v25 = vld [vmem:[#allocation2 + $0x78] ss:$12 sps:$4 sm:$0xff]   ;;  %v3082_v26 = vld [vmem:[#allocation2 + $0x94] ss:$12 sps:$4 sm:$0xff]   ;;  %v3093_v32 = vld [vmem:[#allocation2 + $0xdc] ss:$12 sps:$4 sm:$0xff]  }
  0x2d   :  { %v3085_v28 = vld [vmem:[#allocation2 + $0xac] ss:$12 sps:$4 sm:$0xff]   ;;  %v3087_v29 = vld [vmem:[#allocation2 + $0xa8] ss:$12 sps:$4 sm:$0xff]   ;;  %v3088_v30 = vld [vmem:[#allocation2 + $0xc4] ss:$12 sps:$4 sm:$0xff]  }
  0x2e   :  { %v3091_v31 = vld [vmem:[#allocation2 + $0xc0] ss:$12 sps:$4 sm:$0xff]   ;;  %v3096_v33 = vld [vmem:[#allocation2 + $0xd8] ss:$12 sps:$4 sm:$0xff]   ;;  %v3101_v35 = vld [vmem:[#allocation2 + $0xf0] ss:$12 sps:$4 sm:$0xff]  }
  0x2f   :  { %180 = vmatpush1.bf16.msra.mxu1 %v154_v12  ;;  %1016 = vmatpush1.bf16.msra.mxu0 %v3069_v17  ;;  %v3098_v34 = vld [vmem:[#allocation2 + $0xf4] ss:$12 sps:$4 sm:$0xff]   ;;  %v3103_v36 = vld [vmem:[#allocation2 + $0x10c] ss:$12 sps:$4 sm:$0xff]   ;;  %v3108_v38 = vld [vmem:[#allocation2 + $0x124] ss:$12 sps:$4 sm:$0xff]  }
  0x30   :  { %218 = vmatprep.subr.bf16.mxu1 %v2622_v13  ;;  %1017 = vmatprep.subr.bf16.mxu0 %v3070_v18  ;;  %v3106_v37 = vld [vmem:[#allocation2 + $0x108] ss:$12 sps:$4 sm:$0xff]   ;;  %v3111_v39 = vld [vmem:[#allocation2 + $0x120] ss:$12 sps:$4 sm:$0xff]   ;;  %v3116_v41 = vld [vmem:[#allocation2 + $0x138] ss:$12 sps:$4 sm:$0xff]  }
  0x31   :  { %v3113_v40 = vld [vmem:[#allocation2 + $0x13c] ss:$12 sps:$4 sm:$0xff]   ;;  %v3118_v42 = vld [vmem:[#allocation2 + $0x154] ss:$12 sps:$4 sm:$0xff]   ;;  %v3100_v8 = vld [vmem:[#allocation2 + $0xf8] ss:$12 sps:$4 sm:$0xff]  }
  0x32   :  { %v86_v43 = vld [vmem:[%s3767_s2 + $0x48] sm:$0xff]  ;;  %v87_v44 = vld [vmem:[%s3767_s2 + $0x50] sm:$0xff]  ;;  %v63_v49 = vld [vmem:[%s3765_s0] sm:$0xf] }
  0x33   :  { %1018 = vmatpush1.bf16.msra.mxu0 %v3072_v19  ;;  %v2629_v45 = vcombine.low %v86_v43, %v86_v43  ;;  %v2631_v46 = vcombine.low %v87_v44, %v87_v44  ;;  %v79_v51 = vld [vmem:[%s3767_s2 + $0x10] sm:$0xff]  ;;  %v2630_v54 = vcombine.high %v86_v43, %v86_v43  ;;  %v84_v59 = vld [vmem:[%s3767_s2 + $0x38] sm:$0xff]  ;;  %v2632_v60 = vcombine.high %v87_v44, %v87_v44  ;;  %v3095_v6 = vld [vmem:[#allocation2 + $0xe0] ss:$12 sps:$4 sm:$0xff]  }
  0x34   :  { %1019 = vmatprep.subr.bf16.mxu0 %v3073_v20  ;;  %v83_v52 = vld [vmem:[%s3767_s2 + $0x30] sm:$0xff]  ;;  %v88_v61 = vld [vmem:[%s3767_s2 + $0x58] sm:$0xff]  ;;  %v2626_v62 = vcombine.high %v80_v58, %v84_v59  ;;  %v2625_v63 = vcombine.low %v80_v58, %v84_v59  ;;  %v3097_v7 = vld [vmem:[#allocation2 + $0x20] ss:$12 sps:$4 sm:$0xff]  }
  0x35   :  { %v160_v47 = vsel %vm152_vm0, %v2629_v45, 0  ;;  %v166_v48 = vsel %vm152_vm0, %v2631_v46, 0  ;;  %v2624_v56 = vcombine.high %v79_v51, %v83_v52  ;;  %v2623_v57 = vcombine.low %v79_v51, %v83_v52  ;;  %v3090_v4 = vld [vmem:[#allocation2 + $0xc8] ss:$12 sps:$4 sm:$0xff]   ;;  %v3102_v9 = vld [vmem:[#allocation2 + $0x38] ss:$12 sps:$4 sm:$0xff]  }
  0x36   :  { %v2634_v1 = vcombine.high %v88_v61, %v88_v61  ;;  %v2633_v2 = vcombine.low %v88_v61, %v88_v61  ;;  %v3092_v5 = vld [vmem:[#allocation2 + $0x8] ss:$12 sps:$4 sm:$0xff]   ;;  %v3105_v10 = vld [vmem:[#allocation2 + $0x110] ss:$12 sps:$4 sm:$0xff]   ;;  %v3115_v13 = vld [vmem:[#allocation2 + $0x140] ss:$12 sps:$4 sm:$0xff]  }
  0x37   :  { %1020 = vmatpush1.bf16.msra.mxu0 %v3075_v21  ;;  %v3112_v12 = vld [vmem:[#allocation2 + $0x68] ss:$12 sps:$4 sm:$0xff]   ;;  %v3117_v14 = vld [vmem:[#allocation2 + $0x80] ss:$12 sps:$4 sm:$0xff]   ;;  %v3120_v15 = vld [vmem:[#allocation2 + $0x158] ss:$12 sps:$4 sm:$0xff]  }
  0x38   :  { %1021 = vmatprep.subr.bf16.mxu0 %v3076_v22  ;;  %v172_v3 = vsel %vm152_vm0, %v2633_v2, 0  ;;  %v3121_v16 = vld [vmem:[#allocation2 + $0x150] ss:$12 sps:$4 sm:$0xff]   ;;  %v3122_v17 = vld [vmem:[#allocation2 + $0x98] ss:$12 sps:$4 sm:$0xff]  }
  0x39   :  { %v3123_v18 = vld [vmem:[#allocation2 + $0x16c] ss:$12 sps:$4 sm:$0xff]   ;;  %v3125_v19 = vld [vmem:[#allocation2 + $0x170] ss:$12 sps:$4 sm:$0xff]   ;;  %v3126_v20 = vld [vmem:[#allocation2 + $0x168] ss:$12 sps:$4 sm:$0xff]  }
  0x3a   :  { %v3127_v21 = vld [vmem:[#allocation2 + $0xb0] ss:$12 sps:$4 sm:$0xff]   ;;  %v3140_v44 = vld [vmem:[#allocation2 + $0x1b4] ss:$12 sps:$4 sm:$0xff]   ;;  %v3141_v45 = vld [vmem:[#allocation2 + $0x278] ss:$12 sps:$4 sm:$0xff]  }
  0x3b   :  { %1022 = vmatpush1.bf16.msra.mxu0 %v3078_v23  ;;  %v3130_v22 = vld [vmem:[#allocation2 + $0x184] ss:$12 sps:$4 sm:$0xff]   ;;  %v3131_v23 = vld [vmem:[#allocation2 + $0x248] ss:$12 sps:$4 sm:$0xff]   ;;  %v3145_v51 = vld [vmem:[#allocation2 + $0x1cc] ss:$12 sps:$4 sm:$0xff]  }
  0x3c   :  { %1023 = vmatprep.subr.bf16.mxu0 %v3079_v24  ;;  %v3146_v52 = vld [vmem:[#allocation2 + $0x290] ss:$12 sps:$4 sm:$0xff]   ;;  %v3151_v59 = vld [vmem:[#allocation2 + $0x2a8] ss:$12 sps:$4 sm:$0xff]   ;;  %v3148_v61 = vld [vmem:[#allocation2 + $0x1e0] ss:$12 sps:$4 sm:$0xff]  }
  0x3d   :  { %v3150_v58 = vld [vmem:[#allocation2 + $0x1e4] ss:$12 sps:$4 sm:$0xff]  }
  0x3f   :  { %1024 = vmatpush1.bf16.msra.mxu0 %v3081_v25 }
  0x40   :  { %1025 = vmatprep.subr.bf16.mxu0 %v3082_v26 }
  0x43   :  { %1026 = vmatpush1.bf16.msra.mxu0 %v3084_v27 }
  0x44   :  { %1027 = vmatprep.subr.bf16.mxu0 %v3085_v28 }
  0x47   :  { %1028 = vmatpush1.bf16.msra.mxu0 %v3087_v29 }
  0x48   :  { %1029 = vmatprep.subr.bf16.mxu0 %v3088_v30 }
  0x4b   :  { %1030 = vmatpush1.bf16.msra.mxu0 %v3091_v31 }
  0x4c   :  { %1031 = vmatprep.subr.bf16.mxu0 %v3093_v32  ;;  %v3128_v32 = vld [vmem:[#allocation2 + $0x180] ss:$12 sps:$4 sm:$0xff]  }
  0x4f   :  { %1032 = vmatpush1.bf16.msra.mxu0 %v3096_v33  ;;  %v3132_v33 = vld [vmem:[#allocation2 + $0x188] ss:$12 sps:$4 sm:$0xff]  }
  0x50   :  { %1033 = vmatprep.subr.bf16.mxu0 %v3098_v34 }
  0x53   :  { %1034 = vmatpush1.bf16.msra.mxu0 %v3101_v35  ;;  %v3135_v35 = vld [vmem:[#allocation2 + $0x19c] ss:$12 sps:$4 sm:$0xff]  }
  0x54   :  { %1035 = vmatprep.subr.bf16.mxu0 %v3103_v36  ;;  %v3136_v36 = vld [vmem:[#allocation2 + $0x260] ss:$12 sps:$4 sm:$0xff]  }
  0x57   :  { %1036 = vmatpush1.bf16.msra.mxu0 %v3106_v37 }
  0x58   :  { %1037 = vmatprep.subr.bf16.mxu0 %v3108_v38 }
  0x5b   :  { %1038 = vmatpush1.bf16.msra.mxu0 %v3111_v39 }
  0x5c   :  { %1039 = vmatprep.subr.bf16.mxu0 %v3113_v40  ;;  %v3133_v40 = vld [vmem:[#allocation2 + $0x198] ss:$12 sps:$4 sm:$0xff]  }
  0x5f   :  { %1040 = vmatpush1.bf16.msra.mxu0 %v3116_v41  ;;  %v3137_v41 = vld [vmem:[#allocation2 + $0x1a0] ss:$12 sps:$4 sm:$0xff]  }
  0x60   :  { %1041 = vmatprep.subr.bf16.mxu0 %v3118_v42 }
  0x63   :  { %1042 = vmatpush1.bf16.msra.mxu0 %v3121_v16  ;;  %v3167_v16 = vld [vmem:[#allocation2 + $0x230] ss:$12 sps:$4 sm:$0xff]  }
  0x64   :  { %1043 = vmatprep.subr.bf16.mxu0 %v3123_v18  ;;  %v3173_v18 = vld [vmem:[#allocation4 + $0x4] ss:$12 sps:$4 sm:$0xff]  }
  0x67   :  { %1044 = vmatpush1.bf16.msra.mxu0 %v3126_v20 }
  0x68   :  { %1054 = vmatprep.subr.bf16.mxu0 %v3130_v22  ;;  %v3171_v22 = vld [vmem:[#allocation4] ss:$12 sps:$4 sm:$0xff]  }
  0x98   :  { %v69_v50 = vpop.permute.xlu0 %68 }
  0x99   :  { %v73_v53 = vsel %vm70_vm1, %v63_v49, %v69_v50  ;;  %v3142_v49 = vld [vmem:[#allocation2 + $0x1b8] ss:$12 sps:$4 sm:$0xff]  }
  0x9a   :  { %v76_v55 = vsel %vm74_vm2, %v73_v53, 1065369472  ;;  %vm2610_vm2 = vcmask 15360  }
  0x9b   :  { %2636 = vmatmul.mubr.msk.bf16.vlgmr.msra.gmra.mrb[0].mxu1 %vm149_vm3, %v76_v55 }
  0x9c   :  { %219 = vmatpush1.bf16.msra.mxu1 %v2621_v11  ;;  %250 = vmatprep.mubr.bf16.mxu1 %v3420_v0  ;;  %v3110_v11 = vld [vmem:[#allocation2 + $0x128] ss:$12 sps:$4 sm:$0xff]  }
  0x9d   :  { %2637 = vmatprep.subr.msk.bf16.mxu1 %vm152_vm0, %v2630_v54 }
  0xa0   :  { %221 = vmatpush1.bf16.msra.mxu1 %v160_v47 }
  0xa1   :  { %259 = vmatprep.subr.bf16.mxu1 %v2624_v56  ;;  %v3147_v56 = vld [vmem:[#allocation2 + $0x1d0] ss:$12 sps:$4 sm:$0xff]  }
  0xa3   :  { %2638 = vmatmul.mubr.msk.bf16.vlgmr.msra.gmra.mrb[4].mxu1 %vm149_vm3, %v76_v55 }
  0xa4   :  { %260 = vmatpush1.bf16.msra.mxu1 %v2623_v57  ;;  %291 = vmatprep.mubr.bf16.mxu1 %v3420_v0 }
  0xa5   :  { %2639 = vmatprep.subr.msk.bf16.mxu1 %vm152_vm0, %v2632_v60 }
  0xa8   :  { %262 = vmatpush1.bf16.msra.mxu1 %v166_v48  ;;  %v3138_v48 = vld [vmem:[#allocation2 + $0x1b0] ss:$12 sps:$4 sm:$0xff]  }
  0xa9   :  { %300 = vmatprep.subr.bf16.mxu1 %v2626_v62  ;;  %v3152_v62 = vld [vmem:[#allocation2 + $0x1e8] ss:$12 sps:$4 sm:$0xff]  }
  0xab   :  { %2640 = vmatmul.mubr.msk.bf16.vlgmr.msra.gmra.mrb[8].mxu1 %vm149_vm3, %v76_v55 }
  0xac   :  { %301 = vmatpush1.bf16.msra.mxu1 %v2625_v63  ;;  %332 = vmatprep.mubr.bf16.mxu1 %v3420_v0  ;;  %v3107_v0 = vld [vmem:[#allocation2 + $0x50] ss:$12 sps:$4 sm:$0xff]  }
  0xad   :  { %2641 = vmatprep.subr.msk.bf16.mxu1 %vm152_vm0, %v2634_v1  ;;  %v3155_v63 = vld [vmem:[#allocation2 + $0x1fc] ss:$12 sps:$4 sm:$0xff]   ;;  %v3156_v1 = vld [vmem:[#allocation2 + $0x2c0] ss:$12 sps:$4 sm:$0xff]  }
  0xb0   :  { %303 = vmatpush1.bf16.msra.mxu1 %v172_v3 }
  0xb1   :  { %2886 = vmatprep.subr.bf16.mxu1 %v3090_v4  ;;  %v3153_v4 = vld [vmem:[#allocation2 + $0x1f8] ss:$12 sps:$4 sm:$0xff]  }
  0xb3   :  { %2642 = vmatmul.mubr.msk.bf16.vlgmr.msra.gmra.mrb[12].mxu1 %vm149_vm3, %v76_v55  ;;  %v3143_v55 = vld [vmem:[#allocation2 + $0x1c8] ss:$12 sps:$4 sm:$0xff]  }
  0xb4   :  { %2887 = vmatpush3.bf16.msra.mxu1 %v3092_v5  ;;  %v3157_v5 = vld [vmem:[#allocation2 + $0x200] ss:$12 sps:$4 sm:$0xff]  }
  0xb5   :  { %2888 = vmatprep.subr.bf16.mxu1 %v3095_v6 }
  0xb8   :  { %2889 = vmatpush3.bf16.msra.mxu1 %v3097_v7  ;;  %v3160_v7 = vld [vmem:[#allocation2 + $0x214] ss:$12 sps:$4 sm:$0xff]  }
  0xb9   :  { %2890 = vmatprep.subr.bf16.mxu1 %v3100_v8  ;;  %v3161_v8 = vld [vmem:[#allocation2 + $0x2d8] ss:$12 sps:$4 sm:$0xff]  }
  0xbc   :  { %2891 = vmatpush3.bf16.msra.mxu1 %v3102_v9 }
  0xbd   :  { %2892 = vmatprep.subr.bf16.mxu1 %v3105_v10  ;;  %v3158_v10 = vld [vmem:[#allocation2 + $0x210] ss:$12 sps:$4 sm:$0xff]  }
  0xc0   :  { %2893 = vmatpush3.bf16.msra.mxu1 %v3107_v0  ;;  %v3162_v0 = vld [vmem:[#allocation2 + $0x218] ss:$12 sps:$4 sm:$0xff]  }
  0xc1   :  { %2894 = vmatprep.subr.bf16.mxu1 %v3110_v11  ;;  %v3165_v11 = vld [vmem:[#allocation2 + $0x22c] ss:$12 sps:$4 sm:$0xff]  }
  0xc4   :  { %2895 = vmatpush3.bf16.msra.mxu1 %v3112_v12  ;;  %v3166_v12 = vld [vmem:[#allocation2 + $0x2f0] ss:$12 sps:$4 sm:$0xff]  }
  0xc5   :  { %2896 = vmatprep.subr.bf16.mxu1 %v3115_v13 }
  0xc8   :  { %2897 = vmatpush3.bf16.msra.mxu1 %v3117_v14 }
  0xc9   :  { %2898 = vmatprep.subr.bf16.mxu1 %v3120_v15  ;;  %v3163_v15 = vld [vmem:[#allocation2 + $0x228] ss:$12 sps:$4 sm:$0xff]  }
  0xcc   :  { %2899 = vmatpush3.bf16.msra.mxu1 %v3122_v17  ;;  %v3170_v17 = vld [vmem:[#allocation2 + $0x244] ss:$12 sps:$4 sm:$0xff]  }
  0xcd   :  { %2900 = vmatprep.subr.bf16.mxu1 %v3125_v19 }
  0xd0   :  { %2901 = vmatpush3.bf16.msra.mxu1 %v3127_v21  ;;  %v3168_v21 = vld [vmem:[#allocation2 + $0x240] ss:$12 sps:$4 sm:$0xff]  }
  0xd1   :  { %2908 = vmatprep.subr.bf16.mxu1 %v3131_v23  ;;  %v3176_v23 = vld [vmem:[#allocation2 + $0x25c] ss:$12 sps:$4 sm:$0xff]  }
 0x16e   :  { %v211_v24 = vpop.f32.mrb[0].mxu1 }
 0x16f   :  { %v341_v25 = vpack.c.bf16 %v211_v24, %v211_v24  ;;  %v213_v26 = vpop.f32.mrb[1].mxu1 }
 0x170   :  { %v342_v27 = vpack.c.bf16 %v213_v26, %v213_v26  ;;  %v215_v28 = vpop.f32.mrb[2].mxu1 }
 0x171   :  { %v357_v29 = vmul.bf16 1009007652, %v341_v25  ;;  %v216_v30 = vpop.f32.mrb[3].mxu1  ;;  %vm349_vm5 = vcmp.ge.bf16.partialorder %v341_v25, 0  ;;  %v3177_v28 = vld [vmem:[#allocation4 + $0x18] ss:$12 sps:$4 sm:$0xff]  }
 0x172   :  { %vm350_vm4 = vcmp.ge.bf16.partialorder %v342_v27, 0  ;;  %v358_v31 = vmul.bf16 1009007652, %v342_v27  ;;  %v3185_v30 = vld [vmem:[#allocation4 + $0x34] ss:$12 sps:$4 sm:$0xff]  }
 0x173   :  { %v365_v37 = vsel %vm349_vm5, %v341_v25, %v357_v29  ;;  %v3179_v25 = vld [vmem:[#allocation4 + $0x1c] ss:$12 sps:$4 sm:$0xff]   ;;  %v3182_v29 = vld [vmem:[#allocation2 + $0x274] ss:$12 sps:$4 sm:$0xff]  }
 0x174   :  { %v366_v34 = vsel %vm350_vm4, %v342_v27, %v358_v31  ;;  %v3174_v27 = vld [vmem:[#allocation2 + $0x258] ss:$12 sps:$4 sm:$0xff]   ;;  %v3180_v31 = vld [vmem:[#allocation2 + $0x270] ss:$12 sps:$4 sm:$0xff]  }
 0x175   :  { %1045 = vmatprep.mubr.bf16.mxu0 %v366_v34  ;;  %1127 = vmatprep.mubr.bf16.mxu1 %v366_v34  ;;  %v3191_v34 = vld [vmem:[#allocation4 + $0x4c] ss:$12 sps:$4 sm:$0xff]  }
 0x176   :  { %v3566_v38 = vpop.f32.mrb[4].mxu1  ;;  %1046 = vmatmul.mubr.bf16.vlgmr.msra.gmra.mrb[0].mxu0 %v365_v37  ;;  %1128 = vmatmul.mubr.bf16.vlgmr.msra.gmra.mrb[16].mxu1 %v365_v37  ;;  %v3194_v37 = vld [vmem:[#allocation2 + $0x2a4] ss:$12 sps:$4 sm:$0xff]  }
 0x177   :  { %1055 = vmatpush1.bf16.msra.mxu0 %v3128_v32  ;;  %2909 = vmatpush3.bf16.msra.mxu1 %v3132_v33  ;;  %v254_v39 = vpop.f32.mrb[5].mxu1  ;;  %v343_v13 = vpack.c.bf16 %v3566_v38, %v3566_v38  ;;  %v3183_v32 = vld [vmem:[#allocation4 + $0x30] ss:$12 sps:$4 sm:$0xff]   ;;  %v3188_v33 = vld [vmem:[#allocation2 + $0x28c] ss:$12 sps:$4 sm:$0xff]  }
 0x178   :  { %v344_v42 = vpack.c.bf16 %v254_v39, %v254_v39  ;;  %v256_v43 = vpop.f32.mrb[6].mxu1  ;;  %1056 = vmatprep.subr.bf16.mxu0 %v3135_v35  ;;  %2910 = vmatprep.subr.bf16.mxu1 %v3136_v36  ;;  %v3186_v35 = vld [vmem:[#allocation2 + $0x288] ss:$12 sps:$4 sm:$0xff]   ;;  %v3197_v38 = vld [vmem:[#allocation4 + $0x64] ss:$12 sps:$4 sm:$0xff]  }
 0x179   :  { %v257_v46 = vpop.f32.mrb[7].mxu1  ;;  %v359_v19 = vmul.bf16 1009007652, %v343_v13  ;;  %vm351_vm7 = vcmp.ge.bf16.partialorder %v343_v13, 0  ;;  %v3189_v36 = vld [vmem:[#allocation4 + $0x48] ss:$12 sps:$4 sm:$0xff]  }
 0x17a   :  { %v360_v47 = vmul.bf16 1009007652, %v344_v42  ;;  %vm352_vm6 = vcmp.ge.bf16.partialorder %v344_v42, 0  ;;  %v3192_v39 = vld [vmem:[#allocation2 + $0x2a0] ss:$12 sps:$4 sm:$0xff]  }
 0x17b   :  { %1057 = vmatpush1.bf16.msra.mxu0 %v3133_v40  ;;  %2911 = vmatpush3.bf16.msra.mxu1 %v3137_v41  ;;  %v3576_v24 = vsel %vm351_vm7, %v343_v13, %v359_v19  ;;  %v3195_v40 = vld [vmem:[#allocation4 + $0x60] ss:$12 sps:$4 sm:$0xff]   ;;  %v3200_v41 = vld [vmem:[#allocation2 + $0x2bc] ss:$12 sps:$4 sm:$0xff]   ;;  %v3198_v43 = vld [vmem:[#allocation2 + $0x2b8] ss:$12 sps:$4 sm:$0xff]  }
 0x17c   :  { %1058 = vmatprep.subr.bf16.mxu0 %v3140_v44  ;;  %v368_v50 = vsel %vm352_vm6, %v344_v42, %v360_v47  ;;  %2912 = vmatprep.subr.bf16.mxu1 %v3141_v45  ;;  %v3203_v42 = vld [vmem:[#allocation4 + $0x7c] ss:$12 sps:$4 sm:$0xff]   ;;  %v3201_v44 = vld [vmem:[#allocation4 + $0x78] ss:$12 sps:$4 sm:$0xff]   ;;  %v3206_v45 = vld [vmem:[#allocation2 + $0x2d4] ss:$12 sps:$4 sm:$0xff]  }
 0x17d   :  { %1086 = vmatprep.mubr.bf16.mxu0 %v368_v50  ;;  %1167 = vmatprep.mubr.bf16.mxu1 %v368_v50  ;;  %v3209_v46 = vld [vmem:[#allocation4 + $0x94] ss:$12 sps:$4 sm:$0xff]   ;;  %v3204_v47 = vld [vmem:[#allocation2 + $0x2d0] ss:$12 sps:$4 sm:$0xff]   ;;  %v3215_v50 = vld [vmem:[#allocation4 + $0xac] ss:$12 sps:$4 sm:$0xff]  }
 0x17e   :  { %v3568_v53 = vpop.f32.mrb[8].mxu1  ;;  %v3244_v13 = vld [vmem:[#allocation4 + $0x140] ss:$12 sps:$4 sm:$0xff]   ;;  %v3250_v19 = vld [vmem:[#allocation4 + $0x98] ss:$12 sps:$4 sm:$0xff]  }
 0x17f   :  { %1059 = vmatpush1.bf16.msra.mxu0 %v3138_v48  ;;  %2913 = vmatpush3.bf16.msra.mxu1 %v3142_v49  ;;  %v295_v54 = vpop.f32.mrb[9].mxu1  ;;  %v3207_v48 = vld [vmem:[#allocation4 + $0x90] ss:$12 sps:$4 sm:$0xff]   ;;  %v3212_v49 = vld [vmem:[#allocation2 + $0x2ec] ss:$12 sps:$4 sm:$0xff]  }
 0x180   :  { %v297_v57 = vpop.f32.mrb[10].mxu1  ;;  %1060 = vmatprep.subr.bf16.mxu0 %v3145_v51  ;;  %2914 = vmatprep.subr.bf16.mxu1 %v3146_v52  ;;  %v346_v14 = vpack.c.bf16 %v295_v54, %v295_v54  ;;  %v3210_v51 = vld [vmem:[#allocation2 + $0x2e8] ss:$12 sps:$4 sm:$0xff]   ;;  %v3218_v54 = vld [vmem:[#allocation4 + $0xc4] ss:$12 sps:$4 sm:$0xff]  }
 0x181   :  { %v298_v60 = vpop.f32.mrb[11].mxu1  ;;  %v3213_v52 = vld [vmem:[#allocation4 + $0xa8] ss:$12 sps:$4 sm:$0xff]  }
 0x182   :  { %v362_v20 = vmul.bf16 1009007652, %v346_v14  ;;  %vm354_vm8 = vcmp.ge.bf16.partialorder %v346_v14, 0  ;;  %v3220_v57 = vld [vmem:[#allocation4 + $0x8] ss:$12 sps:$4 sm:$0xff]  }
 0x183   :  { %1061 = vmatpush1.bf16.msra.mxu0 %v3143_v55  ;;  %2915 = vmatpush3.bf16.msra.mxu1 %v3147_v56  ;;  %v3219_v55 = vld [vmem:[#allocation4 + $0xc8] ss:$12 sps:$4 sm:$0xff]   ;;  %v3216_v56 = vld [vmem:[#allocation4 + $0xc0] ss:$12 sps:$4 sm:$0xff]   ;;  %v3221_v60 = vld [vmem:[#allocation4 + $0xd8] ss:$12 sps:$4 sm:$0xff]  }
 0x184   :  { %1062 = vmatprep.subr.bf16.mxu0 %v3150_v58  ;;  %2916 = vmatprep.subr.bf16.mxu1 %v3151_v59  ;;  %v3579_v26 = vsel %vm354_vm8, %v346_v14, %v362_v20  ;;  %v3223_v58 = vld [vmem:[#allocation4 + $0xdc] ss:$12 sps:$4 sm:$0xff]   ;;  %v3224_v59 = vld [vmem:[#allocation4 + $0xe0] ss:$12 sps:$4 sm:$0xff]   ;;  %v3241_v14 = vld [vmem:[#allocation4 + $0x138] ss:$12 sps:$4 sm:$0xff]  }
 0x185   :  { %v3253_v20 = vld [vmem:[#allocation4 + $0x16c] ss:$12 sps:$4 sm:$0xff]  }
 0x186   :  { %v3570_v2 = vpop.f32.mrb[12].mxu1 }
 0x187   :  { %1063 = vmatpush1.bf16.msra.mxu0 %v3148_v61  ;;  %2917 = vmatpush3.bf16.msra.mxu1 %v3152_v62  ;;  %v3572_v3 = vpop.f32.mrb[13].mxu1  ;;  %v3225_v61 = vld [vmem:[#allocation4 + $0x20] ss:$12 sps:$4 sm:$0xff]  }
 0x188   :  { %v338_v6 = vpop.f32.mrb[14].mxu1  ;;  %1064 = vmatprep.subr.bf16.mxu0 %v3155_v63  ;;  %2918 = vmatprep.subr.bf16.mxu1 %v3156_v1  ;;  %v3228_v62 = vld [vmem:[#allocation4 + $0xf4] ss:$12 sps:$4 sm:$0xff]   ;;  %v3229_v63 = vld [vmem:[#allocation4 + $0xf8] ss:$12 sps:$4 sm:$0xff]  }
 0x189   :  { %v339_v9 = vpop.f32.mrb[15].mxu1  ;;  %v3226_v1 = vld [vmem:[#allocation4 + $0xf0] ss:$12 sps:$4 sm:$0xff]  }
 0x18a   :  { %v3234_v6 = vld [vmem:[#allocation4 + $0x110] ss:$12 sps:$4 sm:$0xff]  }
 0x18b   :  { %1065 = vmatpush1.bf16.msra.mxu0 %v3153_v4  ;;  %2919 = vmatpush3.bf16.msra.mxu1 %v3157_v5  ;;  %v3230_v4 = vld [vmem:[#allocation4 + $0x38] ss:$12 sps:$4 sm:$0xff]  }
 0x18c   :  { %1066 = vmatprep.subr.bf16.mxu0 %v3160_v7  ;;  %2920 = vmatprep.subr.bf16.mxu1 %v3161_v8  ;;  %v3233_v5 = vld [vmem:[#allocation4 + $0x10c] ss:$12 sps:$4 sm:$0xff]   ;;  %v3231_v7 = vld [vmem:[#allocation4 + $0x108] ss:$12 sps:$4 sm:$0xff]   ;;  %v3235_v8 = vld [vmem:[#allocation4 + $0x50] ss:$12 sps:$4 sm:$0xff]  }
 0x18d   :  { %v3238_v9 = vld [vmem:[#allocation4 + $0x124] ss:$12 sps:$4 sm:$0xff]  }
 0x18f   :  { %1067 = vmatpush1.bf16.msra.mxu0 %v3158_v10  ;;  %2921 = vmatpush3.bf16.msra.mxu1 %v3162_v0  ;;  %v3239_v10 = vld [vmem:[#allocation4 + $0x128] ss:$12 sps:$4 sm:$0xff]   ;;  %v3236_v0 = vld [vmem:[#allocation4 + $0x120] ss:$12 sps:$4 sm:$0xff]  }
 0x190   :  { %1068 = vmatprep.subr.bf16.mxu0 %v3165_v11  ;;  %2922 = vmatprep.subr.bf16.mxu1 %v3166_v12  ;;  %v3240_v11 = vld [vmem:[#allocation4 + $0x68] ss:$12 sps:$4 sm:$0xff]  }
 0x191   :  { %v3243_v12 = vld [vmem:[#allocation4 + $0x13c] ss:$12 sps:$4 sm:$0xff]  }
 0x193   :  { %1069 = vmatpush1.bf16.msra.mxu0 %v3163_v15  ;;  %2923 = vmatpush3.bf16.msra.mxu1 %v3167_v16  ;;  %v3245_v15 = vld [vmem:[#allocation4 + $0x80] ss:$12 sps:$4 sm:$0xff]  }
 0x194   :  { %1070 = vmatprep.subr.bf16.mxu0 %v3170_v17  ;;  %1876 = vmatprep.subr.bf16.mxu1 %v3173_v18  ;;  %v3248_v16 = vld [vmem:[#allocation4 + $0x154] ss:$12 sps:$4 sm:$0xff]   ;;  %v3249_v17 = vld [vmem:[#allocation4 + $0x158] ss:$12 sps:$4 sm:$0xff]   ;;  %v3246_v18 = vld [vmem:[#allocation4 + $0x150] ss:$12 sps:$4 sm:$0xff]  }
 0x196   :  { %1168 = vmatmul.mubr.bf16.vlgmr.msra.gmra.mrb[20].mxu1 %v3576_v24 }
 0x197   :  { %1071 = vmatpush1.bf16.msra.mxu0 %v3168_v21  ;;  %1877 = vmatpush1.bf16.msra.mxu1 %v3171_v22  ;;  %v3254_v21 = vld [vmem:[#allocation4 + $0x170] ss:$12 sps:$4 sm:$0xff]   ;;  %v345_v22 = vpack.c.bf16 %v3568_v53, %v3568_v53  ;;  %v3260_v53 = vld [vmem:[#allocation4 + $0x188] ss:$12 sps:$4 sm:$0xff]  }
 0x198   :  { %1908 = vmatprep.mubr.bf16.mxu1 %v3579_v26  ;;  %1072 = vmatprep.subr.bf16.mxu0 %v3176_v23  ;;  %v348_v23 = vpack.c.bf16 %v3572_v3, %v3572_v3  ;;  %v3263_v3 = vld [vmem:[#allocation4 + $0x19c] ss:$12 sps:$4 sm:$0xff]  }
 0x199   :  { %1878 = vmatprep.subr.bf16.mxu1 %v3179_v25  ;;  %v3255_v25 = vld [vmem:[#allocation4 + $0xb0] ss:$12 sps:$4 sm:$0xff]   ;;  %vm353_vm9 = vcmp.ge.bf16.partialorder %v345_v22, 0 }
 0x19a   :  { %vm356_vm10 = vcmp.ge.bf16.partialorder %v348_v23, 0 }
 0x19b   :  { %1073 = vmatpush1.bf16.msra.mxu0 %v3174_v27  ;;  %1879 = vmatpush1.bf16.msra.mxu1 %v3177_v28  ;;  %v3259_v27 = vld [vmem:[#allocation4 + $0x248] ss:$12 sps:$4 sm:$0xff]   ;;  %v361_v28 = vmul.bf16 1009007652, %v345_v22 }
 0x19c   :  { %1074 = vmatprep.subr.bf16.mxu0 %v3182_v29  ;;  %1880 = vmatprep.subr.bf16.mxu1 %v3185_v30  ;;  %v364_v29 = vmul.bf16 1009007652, %v348_v23  ;;  %v3256_v30 = vld [vmem:[#allocation4 + $0x180] ss:$12 sps:$4 sm:$0xff]  }
 0x19f   :  { %1075 = vmatpush1.bf16.msra.mxu0 %v3180_v31  ;;  %1881 = vmatpush1.bf16.msra.mxu1 %v3183_v32  ;;  %v369_v31 = vsel %vm353_vm9, %v345_v22, %v361_v28  ;;  %v3264_v32 = vld [vmem:[#allocation4 + $0x260] ss:$12 sps:$4 sm:$0xff]  }
 0x1a0   :  { %1076 = vmatprep.subr.bf16.mxu0 %v3188_v33  ;;  %1882 = vmatprep.subr.bf16.mxu1 %v3191_v34  ;;  %v372_v33 = vsel %vm356_vm10, %v348_v23, %v364_v29  ;;  %v3261_v34 = vld [vmem:[#allocation4 + $0x198] ss:$12 sps:$4 sm:$0xff]   ;;  %v3330_v22 = vld [vmem:[%s3772_s7 + $0x68] sm:$0xff]   ;;  %v3333_v29 = vld [vmem:[%s3772_s7 + $0x30] sm:$0xff]  }
 0x1a1   :  { %v3311_v23 = vld [vmem:[#allocation4 + $0x2b8] ss:$12 sps:$4 sm:$0xff]  }
 0x1a2   :  { %v3319_v28 = vld [vmem:[#allocation4 + $0x2ec] ss:$12 sps:$4 sm:$0xff]  }
 0x1a3   :  { %1077 = vmatpush1.bf16.msra.mxu0 %v3186_v35  ;;  %1883 = vmatpush1.bf16.msra.mxu1 %v3189_v36  ;;  %v3265_v35 = vld [vmem:[#allocation4 + $0x1a0] ss:$12 sps:$4 sm:$0xff]  }
 0x1a4   :  { %1078 = vmatprep.subr.bf16.mxu0 %v3194_v37  ;;  %1884 = vmatprep.subr.bf16.mxu1 %v3197_v38  ;;  %v3268_v36 = vld [vmem:[#allocation4 + $0x1b4] ss:$12 sps:$4 sm:$0xff]   ;;  %v3269_v37 = vld [vmem:[#allocation4 + $0x278] ss:$12 sps:$4 sm:$0xff]   ;;  %v3266_v38 = vld [vmem:[#allocation4 + $0x1b0] ss:$12 sps:$4 sm:$0xff]  }
 0x1a7   :  { %1079 = vmatpush1.bf16.msra.mxu0 %v3192_v39  ;;  %1885 = vmatpush1.bf16.msra.mxu1 %v3195_v40  ;;  %v3270_v39 = vld [vmem:[#allocation4 + $0x1b8] ss:$12 sps:$4 sm:$0xff]  }
 0x1a8   :  { %1080 = vmatprep.subr.bf16.mxu0 %v3200_v41  ;;  %1886 = vmatprep.subr.bf16.mxu1 %v3203_v42  ;;  %v3273_v40 = vld [vmem:[#allocation4 + $0x1cc] ss:$12 sps:$4 sm:$0xff]   ;;  %v3274_v41 = vld [vmem:[#allocation4 + $0x290] ss:$12 sps:$4 sm:$0xff]   ;;  %v3271_v42 = vld [vmem:[#allocation4 + $0x1c8] ss:$12 sps:$4 sm:$0xff]  }
 0x1ab   :  { %1081 = vmatpush1.bf16.msra.mxu0 %v3198_v43  ;;  %1887 = vmatpush1.bf16.msra.mxu1 %v3201_v44  ;;  %v3275_v43 = vld [vmem:[#allocation4 + $0x1d0] ss:$12 sps:$4 sm:$0xff]  }
 0x1ac   :  { %1082 = vmatprep.subr.bf16.mxu0 %v3206_v45  ;;  %1888 = vmatprep.subr.bf16.mxu1 %v3209_v46  ;;  %v3278_v44 = vld [vmem:[#allocation4 + $0x1e4] ss:$12 sps:$4 sm:$0xff]   ;;  %v3279_v45 = vld [vmem:[#allocation4 + $0x2a8] ss:$12 sps:$4 sm:$0xff]   ;;  %v3276_v46 = vld [vmem:[#allocation4 + $0x1e0] ss:$12 sps:$4 sm:$0xff]  }
 0x1af   :  { %1083 = vmatpush1.bf16.msra.mxu0 %v3204_v47  ;;  %1889 = vmatpush1.bf16.msra.mxu1 %v3207_v48  ;;  %v3280_v47 = vld [vmem:[#allocation4 + $0x1e8] ss:$12 sps:$4 sm:$0xff]  }
 0x1b0   :  { %1084 = vmatprep.subr.bf16.mxu0 %v3212_v49  ;;  %1890 = vmatprep.subr.bf16.mxu1 %v3215_v50  ;;  %v3283_v48 = vld [vmem:[#allocation4 + $0x1fc] ss:$12 sps:$4 sm:$0xff]   ;;  %v3284_v49 = vld [vmem:[#allocation4 + $0x2c0] ss:$12 sps:$4 sm:$0xff]   ;;  %v3281_v50 = vld [vmem:[#allocation4 + $0x1f8] ss:$12 sps:$4 sm:$0xff]  }
 0x1b3   :  { %1085 = vmatpush1.bf16.msra.mxu0 %v3210_v51  ;;  %1891 = vmatpush1.bf16.msra.mxu1 %v3213_v52  ;;  %v3285_v51 = vld [vmem:[#allocation4 + $0x200] ss:$12 sps:$4 sm:$0xff]  }
 0x1b4   :  { %1892 = vmatprep.subr.bf16.mxu1 %v3218_v54  ;;  %2930 = vmatprep.subr.bf16.mxu0 %v3219_v55  ;;  %v3288_v52 = vld [vmem:[#allocation4 + $0x214] ss:$12 sps:$4 sm:$0xff]   ;;  %v3289_v54 = vld [vmem:[#allocation4 + $0x2d8] ss:$12 sps:$4 sm:$0xff]   ;;  %v3286_v55 = vld [vmem:[#allocation4 + $0x210] ss:$12 sps:$4 sm:$0xff]  }
 0x1b6   :  { %1087 = vmatmul.mubr.bf16.vlgmr.msra.gmra.mrb[0].mxu0 %v3576_v24  ;;  %v3251_v24 = vld [vmem:[#allocation4 + $0x168] ss:$12 sps:$4 sm:$0xff]  }
 0x1b7   :  { %1893 = vmatpush1.bf16.msra.mxu1 %v3216_v56  ;;  %2931 = vmatpush3.bf16.msra.mxu0 %v3220_v57  ;;  %v3290_v56 = vld [vmem:[#allocation4 + $0x218] ss:$12 sps:$4 sm:$0xff]  }
 0x1b8   :  { %1990 = vmatprep.mubr.bf16.mxu0 %v3579_v26  ;;  %1894 = vmatprep.subr.bf16.mxu1 %v3223_v58  ;;  %v3258_v26 = vld [vmem:[#allocation4 + $0x184] ss:$12 sps:$4 sm:$0xff]   ;;  %v3293_v57 = vld [vmem:[#allocation4 + $0x22c] ss:$12 sps:$4 sm:$0xff]  }
 0x1b9   :  { %2932 = vmatprep.subr.bf16.mxu0 %v3224_v59  ;;  %v3294_v58 = vld [vmem:[#allocation4 + $0x2f0] ss:$12 sps:$4 sm:$0xff]   ;;  %v347_v59 = vpack.c.bf16 %v3570_v2, %v3570_v2  ;;  %v3321_v2 = vld [vmem:[%s3772_s7] sm:$0xff]  }
 0x1bb   :  { %1895 = vmatpush1.bf16.msra.mxu1 %v3221_v60  ;;  %2933 = vmatpush3.bf16.msra.mxu0 %v3225_v61  ;;  %v3291_v60 = vld [vmem:[#allocation4 + $0x228] ss:$12 sps:$4 sm:$0xff]   ;;  %v3295_v61 = vld [vmem:[#allocation4 + $0x230] ss:$12 sps:$4 sm:$0xff]   ;;  %vm355_vm11 = vcmp.ge.bf16.partialorder %v347_v59, 0 }
 0x1bc   :  { %1896 = vmatprep.subr.bf16.mxu1 %v3228_v62  ;;  %2934 = vmatprep.subr.bf16.mxu0 %v3229_v63  ;;  %v3298_v62 = vld [vmem:[#allocation4 + $0x244] ss:$12 sps:$4 sm:$0xff]  }
 0x1bd   :  { %v3320_v63 = vld [vmem:[%s3772_s7 + $0x40] sm:$0xff]  }
 0x1bf   :  { %1897 = vmatpush1.bf16.msra.mxu1 %v3226_v1  ;;  %2935 = vmatpush3.bf16.msra.mxu0 %v3230_v4  ;;  %v363_v1 = vmul.bf16 1009007652, %v347_v59  ;;  %v3296_v4 = vld [vmem:[#allocation4 + $0x240] ss:$12 sps:$4 sm:$0xff]  }
 0x1c0   :  { %1898 = vmatprep.subr.bf16.mxu1 %v3233_v5  ;;  %2936 = vmatprep.subr.bf16.mxu0 %v3234_v6  ;;  %v3301_v5 = vld [vmem:[#allocation4 + $0x25c] ss:$12 sps:$4 sm:$0xff]  }
 0x1c1   :  { %v3322_v6 = vld [vmem:[%s3772_s7 + $0x48] sm:$0xff]  }
 0x1c3   :  { %1899 = vmatpush1.bf16.msra.mxu1 %v3231_v7  ;;  %2937 = vmatpush3.bf16.msra.mxu0 %v3235_v8  ;;  %v371_v7 = vsel %vm355_vm11, %v347_v59, %v363_v1  ;;  %v3299_v8 = vld [vmem:[#allocation4 + $0x258] ss:$12 sps:$4 sm:$0xff]   ;;  %v3362_v1 = vld [vmem:[%s3772_s7 + $0xb0] sm:$0xff]  }
 0x1c4   :  { %1900 = vmatprep.subr.bf16.mxu1 %v3238_v9  ;;  %2938 = vmatprep.subr.bf16.mxu0 %v3239_v10  ;;  %v3304_v9 = vld [vmem:[#allocation4 + $0x274] ss:$12 sps:$4 sm:$0xff]   ;;  %v3323_v10 = vld [vmem:[%s3772_s7 + $0x8] sm:$0xff]  }
 0x1c7   :  { %1901 = vmatpush1.bf16.msra.mxu1 %v3236_v0  ;;  %2939 = vmatpush3.bf16.msra.mxu0 %v3240_v11  ;;  %v3324_v0 = vld [vmem:[%s3772_s7 + $0x50] sm:$0xff]  }
 0x1c8   :  { %1902 = vmatprep.subr.bf16.mxu1 %v3243_v12  ;;  %2940 = vmatprep.subr.bf16.mxu0 %v3244_v13  ;;  %v3302_v11 = vld [vmem:[#allocation4 + $0x270] ss:$12 sps:$4 sm:$0xff]   ;;  %v3307_v12 = vld [vmem:[#allocation4 + $0x28c] ss:$12 sps:$4 sm:$0xff]  }
 0x1c9   :  { %v3325_v13 = vld [vmem:[%s3772_s7 + $0x10] sm:$0xff]  }
 0x1cb   :  { %1903 = vmatpush1.bf16.msra.mxu1 %v3241_v14  ;;  %2941 = vmatpush3.bf16.msra.mxu0 %v3245_v15  ;;  %v3326_v14 = vld [vmem:[%s3772_s7 + $0x58] sm:$0xff]   ;;  %v3305_v15 = vld [vmem:[#allocation4 + $0x288] ss:$12 sps:$4 sm:$0xff]  }
 0x1cc   :  { %1904 = vmatprep.subr.bf16.mxu1 %v3248_v16  ;;  %2942 = vmatprep.subr.bf16.mxu0 %v3249_v17  ;;  %v3310_v16 = vld [vmem:[#allocation4 + $0x2a4] ss:$12 sps:$4 sm:$0xff]   ;;  %v3327_v17 = vld [vmem:[%s3772_s7 + $0x18] sm:$0xff]  }
 0x1cf   :  { %1905 = vmatpush1.bf16.msra.mxu1 %v3246_v18  ;;  %2943 = vmatpush3.bf16.msra.mxu0 %v3250_v19  ;;  %v3328_v18 = vld [vmem:[%s3772_s7 + $0x60] sm:$0xff]  }
 0x1d0   :  { %1906 = vmatprep.subr.bf16.mxu1 %v3253_v20  ;;  %2944 = vmatprep.subr.bf16.mxu0 %v3254_v21  ;;  %v3308_v19 = vld [vmem:[#allocation4 + $0x2a0] ss:$12 sps:$4 sm:$0xff]   ;;  %v3313_v20 = vld [vmem:[#allocation4 + $0x2bc] ss:$12 sps:$4 sm:$0xff]  }
 0x1d1   :  { %v3329_v21 = vld [vmem:[%s3772_s7 + $0x20] sm:$0xff]  }
 0x1d3   :  { %1907 = vmatpush1.bf16.msra.mxu1 %v3251_v24  ;;  %2945 = vmatpush3.bf16.msra.mxu0 %v3255_v25  ;;  %v3316_v24 = vld [vmem:[#allocation4 + $0x2d4] ss:$12 sps:$4 sm:$0xff]   ;;  %v3331_v25 = vld [vmem:[%s3772_s7 + $0x28] sm:$0xff]  }
 0x1d4   :  { %1917 = vmatprep.subr.bf16.mxu1 %v3258_v26  ;;  %2952 = vmatprep.subr.bf16.mxu0 %v3259_v27  ;;  %v3332_v26 = vld [vmem:[%s3772_s7 + $0x70] sm:$0xff]  }
 0x1d5   :  { %v3314_v27 = vld [vmem:[#allocation4 + $0x2d0] ss:$12 sps:$4 sm:$0xff]  }
 0x1d6   :  { %1909 = vmatmul.mubr.bf16.vlgmr.msra.gmra.mrb[24].mxu1 %v369_v31  ;;  %1991 = vmatmul.mubr.bf16.vlgmr.msra.gmra.mrb[4].mxu0 %v369_v31  ;;  %v3335_v31 = vld [vmem:[%s3772_s7 + $0x38] sm:$0xff]  }
 0x1d7   :  { %1918 = vmatpush1.bf16.msra.mxu1 %v3256_v30  ;;  %1949 = vmatprep.mubr.bf16.mxu1 %v372_v33  ;;  %v3334_v30 = vld [vmem:[%s3772_s7 + $0x78] sm:$0xff]  }
 0x1d8   :  { %2953 = vmatpush3.bf16.msra.mxu0 %v3260_v53  ;;  %2030 = vmatprep.mubr.bf16.mxu0 %v372_v33  ;;  %v3317_v53 = vld [vmem:[#allocation4 + $0x2e8] ss:$12 sps:$4 sm:$0xff]  }
 0x1d9   :  { %1919 = vmatprep.subr.bf16.mxu1 %v3263_v3  ;;  %2954 = vmatprep.subr.bf16.mxu0 %v3264_v32 }
 0x1db   :  { %1920 = vmatpush1.bf16.msra.mxu1 %v3261_v34 }
 0x1dc   :  { %2955 = vmatpush3.bf16.msra.mxu0 %v3265_v35  ;;  %1921 = vmatprep.subr.bf16.mxu1 %v3268_v36  ;;  %v3336_v36 = vld [vmem:[%s3772_s7 + $0xc0] sm:$0xff]  }
 0x1dd   :  { %2956 = vmatprep.subr.bf16.mxu0 %v3269_v37  ;;  %v3337_v37 = vld [vmem:[%s3772_s7 + $0x140] sm:$0xff]  }
 0x1df   :  { %1922 = vmatpush1.bf16.msra.mxu1 %v3266_v38  ;;  %v3338_v38 = vld [vmem:[%s3772_s7 + $0x80] sm:$0xff]  }
 0x1e0   :  { %2957 = vmatpush3.bf16.msra.mxu0 %v3270_v39  ;;  %1923 = vmatprep.subr.bf16.mxu1 %v3273_v40  ;;  %v3340_v39 = vld [vmem:[%s3772_s7 + $0xc8] sm:$0xff]   ;;  %v3422_v40 = vmov 1966171168  }
 0x1e1   :  { %2958 = vmatprep.subr.bf16.mxu0 %v3274_v41  ;;  %v1189_v41 = vunpack.c.l.s4 %v3422_v40 }
 0x1e3   :  { %1924 = vmatpush1.bf16.msra.mxu1 %v3271_v42  ;;  %v1191_v42 = vlaneseq }
 0x1e4   :  { %2959 = vmatpush3.bf16.msra.mxu0 %v3275_v43  ;;  %1925 = vmatprep.subr.bf16.mxu1 %v3278_v44  ;;  %v3342_v43 = vld [vmem:[%s3772_s7 + $0x88] sm:$0xff]   ;;  %v3344_v44 = vld [vmem:[%s3772_s7 + $0xd0] sm:$0xff]  }
 0x1e5   :  { %2960 = vmatprep.subr.bf16.mxu0 %v3279_v45  ;;  %v3346_v45 = vld [vmem:[%s3772_s7 + $0x90] sm:$0xff]  }
 0x1e7   :  { %1926 = vmatpush1.bf16.msra.mxu1 %v3276_v46  ;;  %v1190_v46 = vunpack.c.0.s8 %v1189_v41  ;;  %v3365_v41 = vld [vmem:[%s3772_s7 + $0x178] sm:$0xff]  }
 0x1e8   :  { %2961 = vmatpush3.bf16.msra.mxu0 %v3280_v47  ;;  %1927 = vmatprep.subr.bf16.mxu1 %v3283_v48  ;;  %v1192_v47 = vshrl.u32 %v1191_v42, 7  ;;  %v3348_v48 = vld [vmem:[%s3772_s7 + $0xd8] sm:$0xff]  }
 0x1e9   :  { %2962 = vmatprep.subr.bf16.mxu0 %v3284_v49  ;;  %v3350_v49 = vld [vmem:[%s3772_s7 + $0x98] sm:$0xff]  }
 0x1eb   :  { %1928 = vmatpush1.bf16.msra.mxu1 %v3281_v50  ;;  %v3665_v50 = vsub.s32 %v1190_v46, %v1192_v47  ;;  %v3367_v46 = vld [vmem:[%s3772_s7 + $0x138] sm:$0xff]  }
 0x1ec   :  { %2963 = vmatpush3.bf16.msra.mxu0 %v3285_v51  ;;  %1929 = vmatprep.subr.bf16.mxu1 %v3288_v52  ;;  %v3352_v51 = vld [vmem:[%s3772_s7 + $0xe0] sm:$0xff]  }
 0x1ed   :  { %2964 = vmatprep.subr.bf16.mxu0 %v3289_v54  ;;  %v2739_v52 = vld.sshfl [vmem:[%s3769_s4] sm:$0x13 pattern:$0x75316420] }
 0x1ee   :  { %v3354_v54 = vld [vmem:[%s3772_s7 + $0xa0] sm:$0xff]  }
 0x1ef   :  { %1930 = vmatpush1.bf16.msra.mxu1 %v3286_v55  ;;  %v1194_v55 = vrot.slane %v2739_v52, %v3665_v50 }
 0x1f0   :  { %2965 = vmatpush3.bf16.msra.mxu0 %v3290_v56  ;;  %1931 = vmatprep.subr.bf16.mxu1 %v3293_v57  ;;  %v3356_v56 = vld [vmem:[%s3772_s7 + $0xe8] sm:$0xff]  }
 0x1f1   :  { %2966 = vmatprep.subr.bf16.mxu0 %v3294_v58  ;;  %v3358_v57 = vld [vmem:[%s3772_s7 + $0xa8] sm:$0xff]   ;;  %v1202_v58 = vcombine.high %v1194_v55, %v1194_v55 }
 0x1f3   :  { %1932 = vmatpush1.bf16.msra.mxu1 %v3291_v60  ;;  %v3683_v60 = vsub.s32 0, %v1192_v47  ;;  %v2836_v47 = vld.sshfl [vmem:[%s3771_s6] sm:$0x13 pattern:$0x75316420] }
 0x1f4   :  { %2967 = vmatpush3.bf16.msra.mxu0 %v3295_v61  ;;  %1933 = vmatprep.subr.bf16.mxu1 %v3298_v62  ;;  %v1218_v61 = vpack.i.b16 %v1202_v58, %v1202_v58  ;;  %v3360_v62 = vld [vmem:[%s3772_s7 + $0xf0] sm:$0xff]  }
 0x1f5   :  { %2974 = vmatprep.subr.bf16.mxu0 %v3320_v63 }
 0x1f7   :  { %2031 = vmatmul.mubr.bf16.vlgmr.msra.gmra.mrb[8].mxu0 %v371_v7  ;;  %1934 = vmatpush1.bf16.msra.mxu1 %v3296_v4 }
 0x1f8   :  { %1935 = vmatprep.subr.bf16.mxu1 %v3301_v5  ;;  %2975 = vmatpush3.bf16.msra.mxu0 %v3321_v2 }
 0x1f9   :  { %2976 = vmatprep.subr.bf16.mxu0 %v3322_v6 }
 0x1fb   :  { %1936 = vmatpush1.bf16.msra.mxu1 %v3299_v8  ;;  %v3364_v8 = vld [vmem:[%s3772_s7 + $0xf8] sm:$0xff]  }
 0x1fc   :  { %1937 = vmatprep.subr.bf16.mxu1 %v3304_v9  ;;  %2977 = vmatpush3.bf16.msra.mxu0 %v3323_v10  ;;  %v3366_v9 = vld [vmem:[%s3772_s7 + $0xb8] sm:$0xff]  }
 0x1fd   :  { %2978 = vmatprep.subr.bf16.mxu0 %v3324_v0 }
 0x1ff   :  { %1938 = vmatpush1.bf16.msra.mxu1 %v3302_v11  ;;  %v1187_v11 = vcombine.high %v2739_v52, %v2739_v52 }
 0x200   :  { %1939 = vmatprep.subr.bf16.mxu1 %v3307_v12  ;;  %2979 = vmatpush3.bf16.msra.mxu0 %v3325_v13  ;;  %v1204_v13 = vpack.i.b16 %v1194_v55, %v1194_v55 }
 0x201   :  { %2980 = vmatprep.subr.bf16.mxu0 %v3326_v14  ;;  %v1201_v12 = vrot.slane %v1187_v11, %v3665_v50 }
 0x203   :  { %1940 = vmatpush1.bf16.msra.mxu1 %v3305_v15  ;;  %v1211_v14 = vpack.i.b16 %v1201_v12, %v1201_v12  ;;  %v1209_v15 = vrot.slane %v1204_v13, %v3683_v60 }
 0x204   :  { %1941 = vmatprep.subr.bf16.mxu1 %v3310_v16  ;;  %2981 = vmatpush3.bf16.msra.mxu0 %v3327_v17 }
 0x205   :  { %2982 = vmatprep.subr.bf16.mxu0 %v3328_v18  ;;  %v1216_v17 = vrot.slane %v1211_v14, %v3683_v60 }
 0x207   :  { %1942 = vmatpush1.bf16.msra.mxu1 %v3308_v19 }
 0x208   :  { %1943 = vmatprep.subr.bf16.mxu1 %v3313_v20  ;;  %2983 = vmatpush3.bf16.msra.mxu0 %v3329_v21 }
 0x209   :  { %2984 = vmatprep.subr.bf16.mxu0 %v3330_v22 }
 0x20b   :  { %1944 = vmatpush1.bf16.msra.mxu1 %v3311_v23 }
 0x20c   :  { %1945 = vmatprep.subr.bf16.mxu1 %v3316_v24  ;;  %2985 = vmatpush3.bf16.msra.mxu0 %v3331_v25 }
 0x20d   :  { %2986 = vmatprep.subr.bf16.mxu0 %v3332_v26 }
 0x20f   :  { %1946 = vmatpush1.bf16.msra.mxu1 %v3314_v27  ;;  %v3339_v27 = vld [vmem:[%s3772_s7 + $0x100] sm:$0xff]  }
 0x210   :  { %1947 = vmatprep.subr.bf16.mxu1 %v3319_v28  ;;  %2987 = vmatpush3.bf16.msra.mxu0 %v3333_v29  ;;  %v3341_v29 = vld [vmem:[%s3772_s7 + $0x148] sm:$0xff]  }
 0x211   :  { %2988 = vmatprep.subr.bf16.mxu0 %v3334_v30 }
 0x213   :  { %1948 = vmatpush1.bf16.msra.mxu1 %v3317_v53  ;;  %v3343_v53 = vld [vmem:[%s3772_s7 + $0x108] sm:$0xff]  }
 0x214   :  { %2989 = vmatpush3.bf16.msra.mxu0 %v3335_v31  ;;  %2996 = vmatprep.subr.bf16.mxu1 %v3336_v36  ;;  %v3345_v31 = vld [vmem:[%s3772_s7 + $0x150] sm:$0xff]   ;;  %v3357_v36 = vld [vmem:[%s3772_s7 + $0x168] sm:$0xff]  }
 0x215   :  { %3018 = vmatprep.subr.bf16.mxu0 %v3337_v37  ;;  %v3359_v37 = vld [vmem:[%s3772_s7 + $0x128] sm:$0xff]  }
 0x216   :  { %1950 = vmatmul.mubr.bf16.vlgmr.msra.gmra.mrb[24].mxu1 %v371_v7  ;;  %v1223_v7 = vrot.slane %v1218_v61, %v3683_v60 }
 0x217   :  { %2997 = vmatpush3.bf16.msra.mxu1 %v3338_v38  ;;  %v3361_v38 = vld [vmem:[%s3772_s7 + $0x170] sm:$0xff]  }
 0x218   :  { %2998 = vmatprep.subr.bf16.mxu1 %v3340_v39  ;;  %v3363_v39 = vld [vmem:[%s3772_s7 + $0x130] sm:$0xff]  }
 0x21b   :  { %2999 = vmatpush3.bf16.msra.mxu1 %v3342_v43 }
 0x21c   :  { %3000 = vmatprep.subr.bf16.mxu1 %v3344_v44 }
 0x21f   :  { %3001 = vmatpush3.bf16.msra.mxu1 %v3346_v45 }
 0x220   :  { %3002 = vmatprep.subr.bf16.mxu1 %v3348_v48  ;;  %v2057_v48 = vrot.slane %v2836_v47, %v3665_v50 }
 0x223   :  { %3003 = vmatpush3.bf16.msra.mxu1 %v3350_v49  ;;  %v2065_v49 = vcombine.high %v2057_v48, %v2057_v48 }
 0x224   :  { %3004 = vmatprep.subr.bf16.mxu1 %v3352_v51 }
 0x225   :  { %v2081_v52 = vpack.i.b16 %v2065_v49, %v2065_v49 }
 0x227   :  { %3005 = vmatpush3.bf16.msra.mxu1 %v3354_v54 }
 0x228   :  { %3006 = vmatprep.subr.bf16.mxu1 %v3356_v56 }
 0x22b   :  { %3007 = vmatpush3.bf16.msra.mxu1 %v3358_v57 }
 0x22c   :  { %3008 = vmatprep.subr.bf16.mxu1 %v3360_v62 }
 0x22f   :  { %3009 = vmatpush3.bf16.msra.mxu1 %v3362_v1 }
 0x230   :  { %3010 = vmatprep.subr.bf16.mxu1 %v3364_v8 }
 0x233   :  { %3011 = vmatpush3.bf16.msra.mxu1 %v3366_v9 }
 0x249   :  { %v2902_v3 = vpop.f32.mrb[16].mxu1 }
 0x24a   :  { %v2903_v32 = vpop.f32.mrb[17].mxu1 }
 0x24b   :  { %v2904_v33 = vadd.f32 %v2903_v32, %v2902_v3  ;;  %v2905_v34 = vpop.f32.mrb[18].mxu1  ;;  %v3347_v3 = vld [vmem:[%s3772_s7 + $0x110] sm:$0xff]   ;;  %v3349_v32 = vld [vmem:[%s3772_s7 + $0x158] sm:$0xff]  }
 0x24c   :  { %v2906_v35 = vpop.f32.mrb[19].mxu1  ;;  %v3353_v34 = vld [vmem:[%s3772_s7 + $0x160] sm:$0xff]  }
 0x24d   :  { %v3355_v35 = vld [vmem:[%s3772_s7 + $0x120] sm:$0xff]  }
 0x269   :  { %v2924_v59 = vpop.f32.mrb[20].mxu1 }
 0x26a   :  { %v2925_v63 = vpop.f32.mrb[21].mxu1 }
 0x26b   :  { %v2926_v4 = vadd.f32 %v2925_v63, %v2924_v59  ;;  %v2927_v5 = vpop.f32.mrb[22].mxu1  ;;  %v2086_v59 = vrot.slane %v2081_v52, %v3683_v60 }
 0x26c   :  { %v2928_v2 = vpop.f32.mrb[23].mxu1 }
 0x26d   :  { %v1170_v6 = vadd.f32 %v2926_v4, %v2904_v33  ;;  %v3351_v33 = vld [vmem:[%s3772_s7 + $0x118] sm:$0xff]   ;;  %v2050_v4 = vcombine.high %v2836_v47, %v2836_v47  ;;  %v2067_v2 = vpack.i.b16 %v2057_v48, %v2057_v48 }
 0x26f   :  { %v1177_v10 = vpack.c.bf16 %v1170_v6, %v1170_v6  ;;  %v2064_v5 = vrot.slane %v2050_v4, %v3665_v50 }
 0x271   :  { %v3698_v0 = vadd.bf16 %v1223_v7, %v1177_v10  ;;  %v2074_v6 = vpack.i.b16 %v2064_v5, %v2064_v5  ;;  %v2072_v7 = vrot.slane %v2067_v2, %v3683_v60 }
 0x273   :  { %v2079_v9 = vrot.slane %v2074_v6, %v3683_v60  ;;  %vm1229_vm0 = vcmp.ge.bf16.partialorder %v3698_v0, 0 }
 0x289   :  { %v1088_v16 = vpop.f32.mrb[0].mxu0 }
 0x28a   :  { %v1175_v18 = vpack.c.bf16 %v1088_v16, %v1088_v16  ;;  %v1090_v19 = vpop.f32.mrb[1].mxu0 }
 0x28b   :  { %v1176_v20 = vpack.c.bf16 %v1090_v19, %v1090_v19  ;;  %v1092_v21 = vpop.f32.mrb[2].mxu0 }
 0x28c   :  { %v1224_v22 = vadd.bf16 %v1209_v15, %v1175_v18  ;;  %v1093_v23 = vpop.f32.mrb[3].mxu0 }
 0x28d   :  { %v1225_v24 = vadd.bf16 %v1216_v17, %v1176_v20  ;;  %v1232_v17 = vmul.bf16 1009007652, %v3698_v0 }
 0x28e   :  { %v1230_v25 = vmul.bf16 1009007652, %v1224_v22  ;;  %vm1227_vm13 = vcmp.ge.bf16.partialorder %v1224_v22, 0 }
 0x28f   :  { %vm1228_vm12 = vcmp.ge.bf16.partialorder %v1225_v24, 0  ;;  %v1231_v26 = vmul.bf16 1009007652, %v1225_v24  ;;  %v1235_v20 = vsel %vm1229_vm0, %v3698_v0, %v1232_v17 }
 0x290   :  { %v1233_v30 = vsel %vm1227_vm13, %v1224_v22, %v1230_v25 }
 0x291   :  { %v1234_v28 = vsel %vm1228_vm12, %v1225_v24, %v1231_v26  ;;  %v2837_v26 = vld [vmem:[%s3773_s8] ss:$0 sm:$0xff] }
 0x292   :  { %2522 = vmatprep.mubr.bf16.mxu0 %v1234_v28 }
 0x293   :  { %2523 = vmatmul.mubr.bf16.vlgmr.msra.gmra.mrb[12].mxu0 %v1233_v30 }
 0x294   :  { %3019 = vmatpush3.bf16.msra.mxu0 %v3339_v27 }
 0x295   :  { %3020 = vmatprep.subr.bf16.mxu0 %v3341_v29 }
 0x298   :  { %3021 = vmatpush3.bf16.msra.mxu0 %v3343_v53 }
 0x299   :  { %3022 = vmatprep.subr.bf16.mxu0 %v3345_v31 }
 0x29c   :  { %3023 = vmatpush3.bf16.msra.mxu0 %v3347_v3 }
 0x29d   :  { %3024 = vmatprep.subr.bf16.mxu0 %v3349_v32 }
 0x2a0   :  { %3025 = vmatpush3.bf16.msra.mxu0 %v3351_v33 }
 0x2a1   :  { %3026 = vmatprep.subr.bf16.mxu0 %v3353_v34 }
 0x2a4   :  { %3027 = vmatpush3.bf16.msra.mxu0 %v3355_v35 }
 0x2a5   :  { %3028 = vmatprep.subr.bf16.mxu0 %v3357_v36 }
 0x2a8   :  { %3029 = vmatpush3.bf16.msra.mxu0 %v3359_v37 }
 0x2a9   :  { %v2946_v40 = vpop.f32.mrb[4].mxu0  ;;  %3030 = vmatprep.subr.bf16.mxu0 %v3361_v38 }
 0x2aa   :  { %v2947_v42 = vpop.f32.mrb[5].mxu0 }
 0x2ab   :  { %v2948_v43 = vadd.f32 %v2947_v42, %v2946_v40  ;;  %v2949_v44 = vpop.f32.mrb[6].mxu0 }
 0x2ac   :  { %v2950_v45 = vpop.f32.mrb[7].mxu0  ;;  %3031 = vmatpush3.bf16.msra.mxu0 %v3363_v39 }
 0x2ad   :  { %3032 = vmatprep.subr.bf16.mxu0 %v3365_v41 }
 0x2b0   :  { %3033 = vmatpush3.bf16.msra.mxu0 %v3367_v46 }
 0x2ca   :  { %v2968_v51 = vpop.f32.mrb[8].mxu0 }
 0x2cb   :  { %v2969_v54 = vpop.f32.mrb[9].mxu0 }
 0x2cc   :  { %v2970_v55 = vadd.f32 %v2969_v54, %v2968_v51  ;;  %v2971_v56 = vpop.f32.mrb[10].mxu0 }
 0x2cd   :  { %v2972_v57 = vpop.f32.mrb[11].mxu0 }
 0x2ce   :  { %v2033_v58 = vadd.f32 %v2970_v55, %v2948_v43 }
 0x2d0   :  { %v2040_v61 = vpack.c.bf16 %v2033_v58, %v2033_v58 }
 0x2d2   :  { %v2089_v62 = vadd.bf16 %v2086_v59, %v2040_v61 }
 0x2d4   :  { %vm2092_vm14 = vcmp.ge.bf16.partialorder %v2089_v62, 0  ;;  %v2095_v63 = vmul.bf16 1009007652, %v2089_v62 }
 0x2d6   :  { %v2098_v1 = vsel %vm2092_vm14, %v2089_v62, %v2095_v63 }
 0x2d7   :  { %2602 = vmatprep.mubr.bf16.mxu0 %v2098_v1 }
 0x2e9   :  { %v1951_v8 = vpop.f32.mrb[24].mxu1 }
 0x2ea   :  { %v2038_v10 = vpack.c.bf16 %v1951_v8, %v1951_v8  ;;  %v1953_v11 = vpop.f32.mrb[25].mxu1 }
 0x2eb   :  { %v2039_v12 = vpack.c.bf16 %v1953_v11, %v1953_v11  ;;  %v1955_v13 = vpop.f32.mrb[26].mxu1 }
 0x2ec   :  { %v2087_v14 = vadd.bf16 %v2072_v7, %v2038_v10  ;;  %v1956_v15 = vpop.f32.mrb[27].mxu1 }
 0x2ed   :  { %v2088_v16 = vadd.bf16 %v2079_v9, %v2039_v12 }
 0x2ee   :  { %vm2090_vm15 = vcmp.ge.bf16.partialorder %v2087_v14, 0  ;;  %v2093_v18 = vmul.bf16 1009007652, %v2087_v14 }
 0x2ef   :  { %v2094_v50 = vmul.bf16 1009007652, %v2088_v16  ;;  %vm2091_vm1 = vcmp.ge.bf16.partialorder %v2088_v16, 0 }
 0x2f0   :  { %v2096_v19 = vsel %vm2090_vm15, %v2087_v14, %v2093_v18 }
 0x2f1   :  { %2562 = vmatprep.mubr.bf16.mxu1 %v2096_v19  ;;  %v2097_v60 = vsel %vm2091_vm1, %v2088_v16, %v2094_v50 }
 0x2f2   :  { %2563 = vmatmul.mubr.bf16.vlgmr.msra.gmra.mrb[28].mxu1 %v1235_v20  ;;  %2603 = vmatmul.mubr.bf16.vlgmr.msra.gmra.mrb[16].mxu0 %v2097_v60 }
 0x366   :  { %v2990_v21 = vpop.f32.mrb[12].mxu0 }
 0x367   :  { %v2991_v22 = vpop.f32.mrb[13].mxu0 }
 0x368   :  { %v2992_v23 = vadd.f32 %v2991_v22, %v2990_v21  ;;  %v2993_v24 = vpop.f32.mrb[14].mxu0 }
 0x369   :  { %v2994_v25 = vpop.f32.mrb[15].mxu0 }
 0x36a   :  { %v2525_v53 = vadd.f32 %v2992_v23, %v2837_v26 }
 0x3c5   :  { %v3012_v27 = vpop.f32.mrb[28].mxu1  ;;  %v3034_v28 = vpop.f32.mrb[16].mxu0 }
 0x3c6   :  { %v3013_v29 = vpop.f32.mrb[29].mxu1  ;;  %v3035_v30 = vpop.f32.mrb[17].mxu0 }
 0x3c7   :  { %v3014_v31 = vadd.f32 %v3013_v29, %v3012_v27  ;;  %v3036_v3 = vadd.f32 %v3035_v30, %v3034_v28  ;;  %v3015_v0 = vpop.f32.mrb[30].mxu1  ;;  %v3037_v32 = vpop.f32.mrb[18].mxu0 }
 0x3c8   :  { %v3016_v33 = vpop.f32.mrb[31].mxu1  ;;  %v3038_v34 = vpop.f32.mrb[19].mxu0 }
 0x3c9   :  { %v2565_v35 = vadd.f32 %v3014_v31, %v2525_v53 }
 0x3cb   :  { %v2605_v36 = vadd.f32 %v3036_v3, %v2565_v35 }
 0x3cd   :  { %2611 = vst.msk [vmem:[%s3774_s9] sm:$0xff] %vm2610_vm2, %v2605_v36 }
 0x3ce   :  { %2616 = vsyncpa [#allocation3], 1 }
 0x3cf   :  { %2617 = vsyncpa [#allocation5], 1 }

</bundles_post_ra>
